<compile_context>
chip_gen: v5e
topology: v5e:2x2
jax: 0.10.0
libtpu: 0.0.40
codegen_flags: <defaults>
</compile_context>

<pallas_src>
import functools
import math

import jax
import jax.numpy as jnp
from jax import lax
from jax.experimental import pallas as pl
from jax.experimental.pallas import tpu as pltpu

_SQRT1_2 = 0.7071067811865476


def _gelu_exact(x):
    # nn.GELU() default = exact (erf-based) GELU.
    return 0.5 * x * (1.0 + lax.erf(x * _SQRT1_2))


def _fused_layers_kernel(x_ref, wqkv_ref, wo_ref, w1_ref, w2_ref, vecs_ref,
                         o_ref,
                         h_ref, attn_buf,          # persistent VMEM scratch
                         *, n_heads):
    l = pl.program_id(0)
    n_layers = pl.num_programs(0)

    # Load the input activation once; h_ref persists across the layer grid axis.
    @pl.when(l == 0)
    def _():
        h_ref[...] = x_ref[...]

    h = h_ref[...]                               # (B, E) f32
    B, E = h.shape
    hd = E // n_heads
    scale = 1.0 / math.sqrt(hd)

    # Consolidated per-layer bias / LayerNorm vectors: one (8, 4E) f32 block.
    vecs = vecs_ref[...]
    bqkv = vecs[0:1, :3 * E]
    bo = vecs[1:2, :E]
    ln_g = vecs[2:3, :E]
    ln_b = vecs[3:4, :E]
    b2 = vecs[4:5, :E]
    b1 = vecs[5:6, :]

    # ---- attention (MultiheadAttention over flattened embedding, batch = seq) ----
    hb = h.astype(jnp.bfloat16)
    qkv = jnp.dot(hb, wqkv_ref[...], preferred_element_type=jnp.float32) + bqkv
    q = qkv[:, :E]
    k = qkv[:, E:2 * E]
    v = qkv[:, 2 * E:]

    # Causal mask over the batch axis: torch.triu(ones(B, B), diagonal=1).bool().
    row = lax.broadcasted_iota(jnp.int32, (B, B), 0)
    col = lax.broadcasted_iota(jnp.int32, (B, B), 1)
    masked = col > row

    # Per-head scores, stacked along sublanes -> one batched softmax for all heads.
    s_parts = []
    for hix in range(n_heads):                   # static unrolled loop over heads
        qh = q[:, hix * hd:(hix + 1) * hd]       # (B, hd) f32
        kh = k[:, hix * hd:(hix + 1) * hd]
        s_h = lax.dot_general(qh, kh, (((1,), (1,)), ((), ())),
                              preferred_element_type=jnp.float32) * scale
        s_parts.append(jnp.where(masked, -1e30, s_h))     # keep masking in f32
    s_all = jnp.concatenate(s_parts, axis=0)     # (H*B, B)
    s_all = s_all - jnp.max(s_all, axis=-1, keepdims=True)
    p_all = jnp.exp(s_all)
    p_all = p_all * pl.reciprocal(jnp.sum(p_all, axis=-1, keepdims=True), approx=True)

    # Per-head context written at lane offsets into a (B, E) scratch, then ONE
    # full-K output projection (no K=hd skinny matmuls, no concatenate).
    for hix in range(n_heads):
        p_h = p_all[hix * B:(hix + 1) * B, :]                     # (B, B)
        v_h = v[:, hix * hd:(hix + 1) * hd]                       # (B, hd)
        attn_buf[:, hix * hd:(hix + 1) * hd] = jnp.dot(
            p_h, v_h, preferred_element_type=jnp.float32)

    attn = jnp.dot(attn_buf[...].astype(jnp.bfloat16), wo_ref[...],
                   preferred_element_type=jnp.float32) + bo

    h1 = attn + h                                # residual 1
    # TODO(synk): attn_dropout / ff_dropout are train-mode only; eval (identity) used.

    # ---- ff2: LayerNorm(E) -> Linear(E,4E) -> GELU -> Linear(4E,E) ----
    mu = jnp.mean(h1, axis=-1, keepdims=True)
    var = jnp.mean((h1 - mu) ** 2, axis=-1, keepdims=True)
    ln = (h1 - mu) * lax.rsqrt(var + 1e-5) * ln_g + ln_b

    ff = jnp.dot(ln.astype(jnp.bfloat16), w1_ref[...],
                 preferred_element_type=jnp.float32) + b1
    ff = _gelu_exact(ff)
    ff = jnp.dot(ff.astype(jnp.bfloat16), w2_ref[...],
                 preferred_element_type=jnp.float32) + b2

    h_new = ff + h1                              # residual 2
    h_ref[...] = h_new                           # carry to next layer

    @pl.when(l == n_layers - 1)
    def _():
        o_ref[...] = h_new


def rowcol_transformer_forward(x, packed, n_heads):
    """x: (N, J, D) float32.  packed: (wqkv, wo, w1, w2, vecs) parameter stacks."""
    N, J, D = x.shape
    E = J * D
    wqkv, wo, w1, w2, vecs = packed
    L = wqkv.shape[0]
    assert E % n_heads == 0

    x2 = x.reshape(N, E).astype(jnp.float32)     # 'b n d -> 1 b (n d)', leading 1 dropped

    def layer_spec(shape, mode=None):
        # Per-layer block of a (L, *shape) stack; leading layer dim squeezed.
        idx = lambda l: (l,) + (0,) * len(shape)
        if mode is None:
            return pl.BlockSpec((None,) + shape, idx)
        return pl.BlockSpec((None,) + shape, idx, pipeline_mode=mode)

    # ---- generation-aware VMEM budget ----
    cap = 64 << 20                               # conservative default (v7x physical)
    try:
        cap = int(getattr(pltpu.get_tpu_info(), "vmem_capacity_bytes", cap))
    except Exception:
        pass
    budget = (cap * 13) // 16                    # ~81%: ~52 MiB on v7x, ~104 MiB on v5e/v6e

    param_bytes = sum(int(a.nbytes) for a in packed) // L
    ffn_bytes = (int(w1.nbytes) + int(w2.nbytes)) // L
    act_bytes = (3 * N * E        # x block + out block + h scratch (f32)
                 + N * E          # attn_buf scratch
                 + 3 * N * E      # qkv f32 temporary
                 + 4 * N * E      # FFN intermediate f32
                 ) * 4
    need = 2 * param_bytes + act_bytes + (4 << 20)
    ffn_mode = None
    if need > budget:
        # Single-buffer the dominant FFN weights when double-buffering a whole layer
        # would blow VMEM (matters on v7x at large E); attention weights stay Buffered(2).
        ffn_mode = pl.Buffered(1)
        need = 2 * (param_bytes - ffn_bytes) + ffn_bytes + act_bytes + (4 << 20)
    vmem_limit = int(max(min(need, budget), 16 << 20))

    in_specs = [
        pl.BlockSpec((N, E), lambda l: (0, 0)),          # x (resident across layers)
        layer_spec((E, 3 * E)),                          # wqkv (bf16)
        layer_spec((E, E)),                              # wo   (bf16)
        layer_spec((E, 4 * E), ffn_mode),                # w1   (bf16)
        layer_spec((4 * E, E), ffn_mode),                # w2   (bf16)
        layer_spec((8, 4 * E)),                          # packed biases / LN (f32)
    ]
    out_spec = pl.BlockSpec((N, E), lambda l: (0, 0))

    flops_per_layer = 24 * N * E * E + 4 * N * N * E
    cost = pl.CostEstimate(
        flops=int(L * flops_per_layer),
        transcendentals=int(L * (n_heads * N * N + 4 * N * E + N)),
        bytes_accessed=int(L * param_bytes + 2 * N * E * 4),
    )

    kernel = functools.partial(_fused_layers_kernel, n_heads=n_heads)
    out = pl.pallas_call(
        kernel,
        out_shape=jax.ShapeDtypeStruct((N, E), jnp.float32),
        grid_spec=pltpu.PrefetchScalarGridSpec(
            num_scalar_prefetch=0,
            grid=(L,),
            in_specs=in_specs,
            out_specs=out_spec,
            scratch_shapes=[pltpu.VMEM((N, E), jnp.float32),   # running activation
                            pltpu.VMEM((N, E), jnp.float32)],  # per-head attn buffer
        ),
        compiler_params=pltpu.CompilerParams(
            dimension_semantics=("arbitrary",),       # layers are sequential
            vmem_limit_bytes=vmem_limit,
        ),
        cost_estimate=cost,
    )(x2, wqkv, wo, w1, w2, vecs)
    return out.reshape(N, J, D)


# ---------------- deterministic parameter init (synthetic) ----------------
# Weights are stored pre-transposed vs. PyTorch (i.e. W.T), so the kernel does x @ W.
def init_layer_params(key, E):
    ks = jax.random.split(key, 8)
    s = 0.05
    wq = jax.random.normal(ks[0], (E, E), jnp.float32) * s
    wk = jax.random.normal(ks[1], (E, E), jnp.float32) * s
    wv = jax.random.normal(ks[2], (E, E), jnp.float32) * s
    wo = jax.random.normal(ks[3], (E, E), jnp.float32) * s
    w1 = jax.random.normal(ks[4], (E, 4 * E), jnp.float32) * s
    w2 = jax.random.normal(ks[5], (4 * E, E), jnp.float32) * s
    bq = jax.random.normal(ks[6], (1, E), jnp.float32) * 0.01
    bk = jnp.zeros((1, E), jnp.float32)
    bv = jax.random.normal(ks[7], (1, E), jnp.float32) * 0.01
    bo = jnp.zeros((1, E), jnp.float32)
    b1 = jnp.zeros((1, 4 * E), jnp.float32)
    b2 = jnp.zeros((1, E), jnp.float32)
    ln_g = jnp.ones((1, E), jnp.float32)
    ln_b = jnp.zeros((1, E), jnp.float32)
    return (wq, wk, wv, bq, bk, bv, wo, bo, ln_g, ln_b, w1, b1, w2, b2)


def pack_params(per_layer, E):
    """Fuse + stack per-layer params: (L,E,3E)/(L,E,E)/(L,E,4E)/(L,4E,E) bf16 weights
    plus ONE (L, 8, 4E) f32 block holding all biases and LayerNorm vectors."""
    wqkv_s, wo_s, w1_s, w2_s, vecs_s = [], [], [], [], []
    for p in per_layer:
        (wq, wk, wv, bq, bk, bv, wo, bo, ln_g, ln_b, w1, b1, w2, b2) = p
        wqkv_s.append(jnp.concatenate([wq, wk, wv], axis=-1).astype(jnp.bfloat16))
        wo_s.append(wo.astype(jnp.bfloat16))
        w1_s.append(w1.astype(jnp.bfloat16))
        w2_s.append(w2.astype(jnp.bfloat16))
        vec = jnp.zeros((8, 4 * E), jnp.float32)
        vec = vec.at[0, :3 * E].set(jnp.concatenate([bq, bk, bv], axis=-1)[0])
        vec = vec.at[1, :E].set(bo[0])
        vec = vec.at[2, :E].set(ln_g[0])
        vec = vec.at[3, :E].set(ln_b[0])
        vec = vec.at[4, :E].set(b2[0])
        vec = vec.at[5, :].set(b1[0])
        vecs_s.append(vec)
    return (jnp.stack(wqkv_s), jnp.stack(wo_s), jnp.stack(w1_s),
            jnp.stack(w2_s), jnp.stack(vecs_s))


# ------- pure-JAX reference (same math, same bf16 weight quantization) -------
def reference_forward(x, packed, n_heads):
    wqkv, wo, w1, w2, vecs = packed
    N, J, D = x.shape
    E = J * D
    hd = E // n_heads
    scale = 1.0 / math.sqrt(hd)
    h = x.reshape(N, E).astype(jnp.float32)
    masked = jnp.arange(N)[None, :] > jnp.arange(N)[:, None]
    L = wqkv.shape[0]
    for l in range(L):
        vec = vecs[l]
        bqkv = vec[0:1, :3 * E]
        bo = vec[1:2, :E]
        ln_g = vec[2:3, :E]
        ln_b = vec[3:4, :E]
        b2 = vec[4:5, :E]
        b1 = vec[5:6, :]
        hb = h.astype(jnp.bfloat16)
        qkv = jnp.dot(hb, wqkv[l], preferred_element_type=jnp.float32) + bqkv
        q, k, v = qkv[:, :E], qkv[:, E:2 * E], qkv[:, 2 * E:]
        outs = []
        for hh in range(n_heads):
            sl = slice(hh * hd, (hh + 1) * hd)
            sc = (q[:, sl] @ k[:, sl].T) * scale
            sc = jnp.where(masked, -1e30, sc)
            p = jax.nn.softmax(sc, axis=-1)
            outs.append(p @ v[:, sl])
        attn_in = jnp.concatenate(outs, axis=-1)
        attn = jnp.dot(attn_in.astype(jnp.bfloat16), wo[l],
                       preferred_element_type=jnp.float32) + bo
        h1 = attn + h
        mu = jnp.mean(h1, axis=-1, keepdims=True)
        var = jnp.mean((h1 - mu) ** 2, axis=-1, keepdims=True)
        ln = (h1 - mu) / jnp.sqrt(var + 1e-5) * ln_g + ln_b
        ff = jnp.dot(ln.astype(jnp.bfloat16), w1[l],
                     preferred_element_type=jnp.float32) + b1
        ff = _gelu_exact(ff)
        ff = jnp.dot(ff.astype(jnp.bfloat16), w2[l],
                     preferred_element_type=jnp.float32) + b2
        h = ff + h1
    return h.reshape(N, J, D)


if __name__ == "__main__":
    # Small, TPU-friendly shapes consistent with the module:
    N, J, D = 8, 2, 64        # batch, n_features, d_model  ->  E = 128
    n_heads = 4
    n_layers = 3

    key = jax.random.PRNGKey(0)
    kx, kp = jax.random.split(key)
    x = jax.random.normal(kx, (N, J, D), jnp.float32)
    per_layer = [init_layer_params(k, J * D) for k in jax.random.split(kp, n_layers)]
    packed = pack_params(per_layer, J * D)

    out = jax.block_until_ready(rowcol_transformer_forward(x, packed, n_heads))
    ref = jax.block_until_ready(reference_forward(x, packed, n_heads))

    assert out.shape == (N, J, D)
    max_diff = float(jnp.max(jnp.abs(out - ref)))
    assert jnp.allclose(out, ref, atol=5e-3, rtol=5e-3), (
        f"mismatch vs. pure-JAX reference (max abs diff {max_diff})")

    print("KERNEL_OK")
</pallas_src>

<mosaic_0001>
module attributes {stable_mosaic.version = 11 : i64} {
  func.func @_fused_layers_kernel(%arg0: i32, %arg1: memref<8x128xf32, #tpu.memory_space<vmem>>, %arg2: memref<1x128x384xbf16, #tpu.memory_space<vmem>>, %arg3: memref<1x128x128xbf16, #tpu.memory_space<vmem>>, %arg4: memref<1x128x512xbf16, #tpu.memory_space<vmem>>, %arg5: memref<1x512x128xbf16, #tpu.memory_space<vmem>>, %arg6: memref<1x8x512xf32, #tpu.memory_space<vmem>>, %arg7: memref<8x128xf32, #tpu.memory_space<vmem>>, %arg8: memref<8x128xf32, #tpu.memory_space<vmem>>, %arg9: memref<8x128xf32, #tpu.memory_space<vmem>>) attributes {dimension_semantics = [#tpu.dimension_semantics<arbitrary>], iteration_bounds = array<i64: 3>, scalar_prefetch = 0 : i64, scratch_operands = 2 : i64, tpu.core_type = #tpu.core_type<tc>, window_params = [{pipeline_mode = #tpu.pipeline_mode<synchronous>, transform_indices = @transform_0, window_bounds = array<i64: 8, 128>}, {transform_indices = @transform_1, window_bounds = array<i64: 1, 128, 384>}, {transform_indices = @transform_2, window_bounds = array<i64: 1, 128, 128>}, {transform_indices = @transform_3, window_bounds = array<i64: 1, 128, 512>}, {transform_indices = @transform_4, window_bounds = array<i64: 1, 512, 128>}, {transform_indices = @transform_5, window_bounds = array<i64: 1, 8, 512>}, {pipeline_mode = #tpu.pipeline_mode<synchronous>, transform_indices = @transform_6, window_bounds = array<i64: 8, 128>}]} {
    %c0_i32 = arith.constant 0 : i32
    %0 = arith.cmpi eq, %arg0, %c0_i32 : i32
    %1 = arith.extui %0 : i1 to i32
    %c0_i32_0 = arith.constant 0 : i32
    %2 = arith.cmpi ne, %1, %c0_i32_0 : i32
    scf.if %2 {
      %c0_56 = arith.constant 0 : index
      %c0_57 = arith.constant 0 : index
      %134 = vector.load %arg1[%c0_56, %c0_57] : memref<8x128xf32, #tpu.memory_space<vmem>>, vector<8x128xf32>
      %c0_58 = arith.constant 0 : index
      %c0_59 = arith.constant 0 : index
      %135 = vector.load %arg8[%c0_58, %c0_59] : memref<8x128xf32, #tpu.memory_space<vmem>>, vector<8x128xf32>
      tpu.vector_store %arg8[%c0_58, %c0_59], %134 {strides = array<i32>} : memref<8x128xf32, #tpu.memory_space<vmem>>, vector<8x128xf32>,
    } else {
    }
    %c0 = arith.constant 0 : index
    %c0_1 = arith.constant 0 : index
    %3 = vector.load %arg8[%c0, %c0_1] : memref<8x128xf32, #tpu.memory_space<vmem>>, vector<8x128xf32>
    %c0_2 = arith.constant 0 : index
    %c0_3 = arith.constant 0 : index
    %c0_4 = arith.constant 0 : index
    %4 = vector.load %arg6[%c0_2, %c0_3, %c0_4] : memref<1x8x512xf32, #tpu.memory_space<vmem>>, vector<1x8x512xf32>
    %5 = vector.shape_cast %4 : vector<1x8x512xf32> to vector<8x512xf32>
    %6 = vector.extract_strided_slice %5 {offsets = [0, 0], sizes = [1, 384], strides = [1, 1]} : vector<8x512xf32> to vector<1x384xf32>
    %7 = vector.extract_strided_slice %5 {offsets = [1, 0], sizes = [1, 128], strides = [1, 1]} : vector<8x512xf32> to vector<1x128xf32>
    %8 = vector.extract_strided_slice %5 {offsets = [2, 0], sizes = [1, 128], strides = [1, 1]} : vector<8x512xf32> to vector<1x128xf32>
    %9 = vector.extract_strided_slice %5 {offsets = [3, 0], sizes = [1, 128], strides = [1, 1]} : vector<8x512xf32> to vector<1x128xf32>
    %10 = vector.extract_strided_slice %5 {offsets = [4, 0], sizes = [1, 128], strides = [1, 1]} : vector<8x512xf32> to vector<1x128xf32>
    %11 = vector.extract_strided_slice %5 {offsets = [5, 0], sizes = [1, 512], strides = [1, 1]} : vector<8x512xf32> to vector<1x512xf32>
    %12 = arith.truncf %3 : vector<8x128xf32> to vector<8x128xbf16>
    %c0_5 = arith.constant 0 : index
    %c0_6 = arith.constant 0 : index
    %c0_7 = arith.constant 0 : index
    %13 = vector.load %arg2[%c0_5, %c0_6, %c0_7] : memref<1x128x384xbf16, #tpu.memory_space<vmem>>, vector<1x128x384xbf16>
    %14 = vector.shape_cast %13 : vector<1x128x384xbf16> to vector<128x384xbf16>
    %cst = arith.constant dense<0.000000e+00> : vector<8x384xf32>
    %15 = tpu.matmul %12, %14, %cst {dimension_numbers = #tpu.dot_dimension_numbers<[1], [0], [0], [1], [0, 0, 1, 1], [], []>} : vector<8x128xbf16>, vector<128x384xbf16>, vector<8x384xf32> -> vector<8x384xf32>
    %16 = vector.broadcast %6 : vector<1x384xf32> to vector<8x384xf32>
    %17 = arith.addf %15, %16 : vector<8x384xf32>
    %18 = vector.extract_strided_slice %17 {offsets = [0, 0], sizes = [8, 128], strides = [1, 1]} : vector<8x384xf32> to vector<8x128xf32>
    %19 = vector.extract_strided_slice %17 {offsets = [0, 128], sizes = [8, 128], strides = [1, 1]} : vector<8x384xf32> to vector<8x128xf32>
    %20 = vector.extract_strided_slice %17 {offsets = [0, 256], sizes = [8, 128], strides = [1, 1]} : vector<8x384xf32> to vector<8x128xf32>
    %21 = tpu.iota {dimensions = array<i32: 0>} : vector<8x8xi32>
    %22 = tpu.iota {dimensions = array<i32: 1>} : vector<8x8xi32>
    %23 = arith.cmpi sgt, %22, %21 : vector<8x8xi32>
    %24 = vector.extract_strided_slice %18 {offsets = [0, 0], sizes = [8, 32], strides = [1, 1]} : vector<8x128xf32> to vector<8x32xf32>
    %25 = vector.extract_strided_slice %19 {offsets = [0, 0], sizes = [8, 32], strides = [1, 1]} : vector<8x128xf32> to vector<8x32xf32>
    %cst_8 = arith.constant dense<0.000000e+00> : vector<8x8xf32>
    %26 = tpu.matmul %24, %25, %cst_8 {dimension_numbers = #tpu.dot_dimension_numbers<[1], [1], [0], [0], [0, 0, 1, 0], [], []>} : vector<8x32xf32>, vector<8x32xf32>, vector<8x8xf32> -> vector<8x8xf32>
    %cst_9 = arith.constant 0.176776692 : f32
    %27 = vector.broadcast %cst_9 : f32 to vector<8x8xf32>
    %28 = arith.mulf %26, %27 : vector<8x8xf32>
    %cst_10 = arith.constant -1.000000e+30 : f32
    %29 = vector.broadcast %cst_10 : f32 to vector<8x8xf32>
    %30 = arith.select %23, %29, %28 : vector<8x8xi1>, vector<8x8xf32>
    %31 = vector.extract_strided_slice %18 {offsets = [0, 32], sizes = [8, 32], strides = [1, 1]} : vector<8x128xf32> to vector<8x32xf32>
    %32 = vector.extract_strided_slice %19 {offsets = [0, 32], sizes = [8, 32], strides = [1, 1]} : vector<8x128xf32> to vector<8x32xf32>
    %cst_11 = arith.constant dense<0.000000e+00> : vector<8x8xf32>
    %33 = tpu.matmul %31, %32, %cst_11 {dimension_numbers = #tpu.dot_dimension_numbers<[1], [1], [0], [0], [0, 0, 1, 0], [], []>} : vector<8x32xf32>, vector<8x32xf32>, vector<8x8xf32> -> vector<8x8xf32>
    %cst_12 = arith.constant 0.176776692 : f32
    %34 = vector.broadcast %cst_12 : f32 to vector<8x8xf32>
    %35 = arith.mulf %33, %34 : vector<8x8xf32>
    %cst_13 = arith.constant -1.000000e+30 : f32
    %36 = vector.broadcast %cst_13 : f32 to vector<8x8xf32>
    %37 = arith.select %23, %36, %35 : vector<8x8xi1>, vector<8x8xf32>
    %38 = vector.extract_strided_slice %18 {offsets = [0, 64], sizes = [8, 32], strides = [1, 1]} : vector<8x128xf32> to vector<8x32xf32>
    %39 = vector.extract_strided_slice %19 {offsets = [0, 64], sizes = [8, 32], strides = [1, 1]} : vector<8x128xf32> to vector<8x32xf32>
    %cst_14 = arith.constant dense<0.000000e+00> : vector<8x8xf32>
    %40 = tpu.matmul %38, %39, %cst_14 {dimension_numbers = #tpu.dot_dimension_numbers<[1], [1], [0], [0], [0, 0, 1, 0], [], []>} : vector<8x32xf32>, vector<8x32xf32>, vector<8x8xf32> -> vector<8x8xf32>
    %cst_15 = arith.constant 0.176776692 : f32
    %41 = vector.broadcast %cst_15 : f32 to vector<8x8xf32>
    %42 = arith.mulf %40, %41 : vector<8x8xf32>
    %cst_16 = arith.constant -1.000000e+30 : f32
    %43 = vector.broadcast %cst_16 : f32 to vector<8x8xf32>
    %44 = arith.select %23, %43, %42 : vector<8x8xi1>, vector<8x8xf32>
    %45 = vector.extract_strided_slice %18 {offsets = [0, 96], sizes = [8, 32], strides = [1, 1]} : vector<8x128xf32> to vector<8x32xf32>
    %46 = vector.extract_strided_slice %19 {offsets = [0, 96], sizes = [8, 32], strides = [1, 1]} : vector<8x128xf32> to vector<8x32xf32>
    %cst_17 = arith.constant dense<0.000000e+00> : vector<8x8xf32>
    %47 = tpu.matmul %45, %46, %cst_17 {dimension_numbers = #tpu.dot_dimension_numbers<[1], [1], [0], [0], [0, 0, 1, 0], [], []>} : vector<8x32xf32>, vector<8x32xf32>, vector<8x8xf32> -> vector<8x8xf32>
    %cst_18 = arith.constant 0.176776692 : f32
    %48 = vector.broadcast %cst_18 : f32 to vector<8x8xf32>
    %49 = arith.mulf %47, %48 : vector<8x8xf32>
    %cst_19 = arith.constant -1.000000e+30 : f32
    %50 = vector.broadcast %cst_19 : f32 to vector<8x8xf32>
    %51 = arith.select %23, %50, %49 : vector<8x8xi1>, vector<8x8xf32>
    %52 = tpu.concatenate %30, %37, %44, %51 in 0 : vector<8x8xf32>, vector<8x8xf32>, vector<8x8xf32>, vector<8x8xf32> -> vector<32x8xf32>
    %cst_20 = arith.constant dense<0xFF800000> : vector<32xf32>
    %53 = vector.multi_reduction <maximumf>, %52, %cst_20 [1] : vector<32x8xf32> to vector<32xf32>
    %54 = vector.shape_cast %53 : vector<32xf32> to vector<32x1xf32>
    %55 = vector.broadcast %54 : vector<32x1xf32> to vector<32x8xf32>
    %56 = arith.subf %52, %55 : vector<32x8xf32>
    %57 = math.exp %56 : vector<32x8xf32>
    %cst_21 = arith.constant dense<0.000000e+00> : vector<32xf32>
    %58 = vector.multi_reduction <add>, %57, %cst_21 [1] : vector<32x8xf32> to vector<32xf32>
    %59 = vector.shape_cast %58 : vector<32xf32> to vector<32x1xf32>
    %60 = tpu.reciprocal %59 {approx = true} : vector<32x1xf32> -> vector<32x1xf32>
    %61 = vector.broadcast %60 : vector<32x1xf32> to vector<32x8xf32>
    %62 = arith.mulf %57, %61 : vector<32x8xf32>
    %63 = vector.extract_strided_slice %62 {offsets = [0, 0], sizes = [8, 8], strides = [1, 1]} : vector<32x8xf32> to vector<8x8xf32>
    %64 = vector.extract_strided_slice %20 {offsets = [0, 0], sizes = [8, 32], strides = [1, 1]} : vector<8x128xf32> to vector<8x32xf32>
    %cst_22 = arith.constant dense<0.000000e+00> : vector<8x32xf32>
    %65 = tpu.matmul %63, %64, %cst_22 {dimension_numbers = #tpu.dot_dimension_numbers<[1], [0], [0], [1], [0, 0, 1, 1], [], []>} : vector<8x8xf32>, vector<8x32xf32>, vector<8x32xf32> -> vector<8x32xf32>
    %c0_23 = arith.constant 0 : index
    %c0_24 = arith.constant 0 : index
    %66 = vector.load %arg9[%c0_23, %c0_24] : memref<8x128xf32, #tpu.memory_space<vmem>>, vector<8x32xf32>
    tpu.vector_store %arg9[%c0_23, %c0_24], %65 {strides = array<i32>} : memref<8x128xf32, #tpu.memory_space<vmem>>, vector<8x32xf32>,
    %67 = vector.extract_strided_slice %62 {offsets = [8, 0], sizes = [8, 8], strides = [1, 1]} : vector<32x8xf32> to vector<8x8xf32>
    %68 = vector.extract_strided_slice %20 {offsets = [0, 32], sizes = [8, 32], strides = [1, 1]} : vector<8x128xf32> to vector<8x32xf32>
    %cst_25 = arith.constant dense<0.000000e+00> : vector<8x32xf32>
    %69 = tpu.matmul %67, %68, %cst_25 {dimension_numbers = #tpu.dot_dimension_numbers<[1], [0], [0], [1], [0, 0, 1, 1], [], []>} : vector<8x8xf32>, vector<8x32xf32>, vector<8x32xf32> -> vector<8x32xf32>
    %c0_26 = arith.constant 0 : index
    %c32 = arith.constant 32 : index
    %70 = vector.load %arg9[%c0_26, %c32] : memref<8x128xf32, #tpu.memory_space<vmem>>, vector<8x32xf32>
    tpu.vector_store %arg9[%c0_26, %c32], %69 {strides = array<i32>} : memref<8x128xf32, #tpu.memory_space<vmem>>, vector<8x32xf32>,
    %71 = vector.extract_strided_slice %62 {offsets = [16, 0], sizes = [8, 8], strides = [1, 1]} : vector<32x8xf32> to vector<8x8xf32>
    %72 = vector.extract_strided_slice %20 {offsets = [0, 64], sizes = [8, 32], strides = [1, 1]} : vector<8x128xf32> to vector<8x32xf32>
    %cst_27 = arith.constant dense<0.000000e+00> : vector<8x32xf32>
    %73 = tpu.matmul %71, %72, %cst_27 {dimension_numbers = #tpu.dot_dimension_numbers<[1], [0], [0], [1], [0, 0, 1, 1], [], []>} : vector<8x8xf32>, vector<8x32xf32>, vector<8x32xf32> -> vector<8x32xf32>
    %c0_28 = arith.constant 0 : index
    %c64 = arith.constant 64 : index
    %74 = vector.load %arg9[%c0_28, %c64] : memref<8x128xf32, #tpu.memory_space<vmem>>, vector<8x32xf32>
    tpu.vector_store %arg9[%c0_28, %c64], %73 {strides = array<i32>} : memref<8x128xf32, #tpu.memory_space<vmem>>, vector<8x32xf32>,
    %75 = vector.extract_strided_slice %62 {offsets = [24, 0], sizes = [8, 8], strides = [1, 1]} : vector<32x8xf32> to vector<8x8xf32>
    %76 = vector.extract_strided_slice %20 {offsets = [0, 96], sizes = [8, 32], strides = [1, 1]} : vector<8x128xf32> to vector<8x32xf32>
    %cst_29 = arith.constant dense<0.000000e+00> : vector<8x32xf32>
    %77 = tpu.matmul %75, %76, %cst_29 {dimension_numbers = #tpu.dot_dimension_numbers<[1], [0], [0], [1], [0, 0, 1, 1], [], []>} : vector<8x8xf32>, vector<8x32xf32>, vector<8x32xf32> -> vector<8x32xf32>
    %c0_30 = arith.constant 0 : index
    %c96 = arith.constant 96 : index
    %78 = vector.load %arg9[%c0_30, %c96] : memref<8x128xf32, #tpu.memory_space<vmem>>, vector<8x32xf32>
    tpu.vector_store %arg9[%c0_30, %c96], %77 {strides = array<i32>} : memref<8x128xf32, #tpu.memory_space<vmem>>, vector<8x32xf32>,
    %c0_31 = arith.constant 0 : index
    %c0_32 = arith.constant 0 : index
    %79 = vector.load %arg9[%c0_31, %c0_32] : memref<8x128xf32, #tpu.memory_space<vmem>>, vector<8x128xf32>
    %80 = arith.truncf %79 : vector<8x128xf32> to vector<8x128xbf16>
    %c0_33 = arith.constant 0 : index
    %c0_34 = arith.constant 0 : index
    %c0_35 = arith.constant 0 : index
    %81 = vector.load %arg3[%c0_33, %c0_34, %c0_35] : memref<1x128x128xbf16, #tpu.memory_space<vmem>>, vector<1x128x128xbf16>
    %82 = vector.shape_cast %81 : vector<1x128x128xbf16> to vector<128x128xbf16>
    %cst_36 = arith.constant dense<0.000000e+00> : vector<8x128xf32>
    %83 = tpu.matmul %80, %82, %cst_36 {dimension_numbers = #tpu.dot_dimension_numbers<[1], [0], [0], [1], [0, 0, 1, 1], [], []>} : vector<8x128xbf16>, vector<128x128xbf16>, vector<8x128xf32> -> vector<8x128xf32>
    %84 = vector.broadcast %7 : vector<1x128xf32> to vector<8x128xf32>
    %85 = arith.addf %83, %84 : vector<8x128xf32>
    %86 = arith.addf %85, %3 : vector<8x128xf32>
    %cst_37 = arith.constant dense<0.000000e+00> : vector<8xf32>
    %87 = vector.multi_reduction <add>, %86, %cst_37 [1] : vector<8x128xf32> to vector<8xf32>
    %88 = vector.shape_cast %87 : vector<8xf32> to vector<8x1xf32>
    %cst_38 = arith.constant 1.280000e+02 : f32
    %89 = vector.broadcast %cst_38 : f32 to vector<8x1xf32>
    %90 = arith.divf %88, %89 : vector<8x1xf32>
    %91 = vector.broadcast %90 : vector<8x1xf32> to vector<8x128xf32>
    %92 = arith.subf %86, %91 : vector<8x128xf32>
    %93 = arith.mulf %92, %92 : vector<8x128xf32>
    %cst_39 = arith.constant dense<0.000000e+00> : vector<8xf32>
    %94 = vector.multi_reduction <add>, %93, %cst_39 [1] : vector<8x128xf32> to vector<8xf32>
    %95 = vector.shape_cast %94 : vector<8xf32> to vector<8x1xf32>
    %cst_40 = arith.constant 1.280000e+02 : f32
    %96 = vector.broadcast %cst_40 : f32 to vector<8x1xf32>
    %97 = arith.divf %95, %96 : vector<8x1xf32>
    %98 = vector.broadcast %90 : vector<8x1xf32> to vector<8x128xf32>
    %99 = arith.subf %86, %98 : vector<8x128xf32>
    %cst_41 = arith.constant 9.99999974E-6 : f32
    %100 = vector.broadcast %cst_41 : f32 to vector<8x1xf32>
    %101 = arith.addf %97, %100 : vector<8x1xf32>
    %102 = math.rsqrt %101 : vector<8x1xf32>
    %103 = vector.broadcast %102 : vector<8x1xf32> to vector<8x128xf32>
    %104 = arith.mulf %99, %103 : vector<8x128xf32>
    %105 = vector.broadcast %8 : vector<1x128xf32> to vector<8x128xf32>
    %106 = arith.mulf %104, %105 : vector<8x128xf32>
    %107 = vector.broadcast %9 : vector<1x128xf32> to vector<8x128xf32>
    %108 = arith.addf %106, %107 : vector<8x128xf32>
    %109 = arith.truncf %108 : vector<8x128xf32> to vector<8x128xbf16>
    %c0_42 = arith.constant 0 : index
    %c0_43 = arith.constant 0 : index
    %c0_44 = arith.constant 0 : index
    %110 = vector.load %arg4[%c0_42, %c0_43, %c0_44] : memref<1x128x512xbf16, #tpu.memory_space<vmem>>, vector<1x128x512xbf16>
    %111 = vector.shape_cast %110 : vector<1x128x512xbf16> to vector<128x512xbf16>
    %cst_45 = arith.constant dense<0.000000e+00> : vector<8x512xf32>
    %112 = tpu.matmul %109, %111, %cst_45 {dimension_numbers = #tpu.dot_dimension_numbers<[1], [0], [0], [1], [0, 0, 1, 1], [], []>} : vector<8x128xbf16>, vector<128x512xbf16>, vector<8x512xf32> -> vector<8x512xf32>
    %113 = vector.broadcast %11 : vector<1x512xf32> to vector<8x512xf32>
    %114 = arith.addf %112, %113 : vector<8x512xf32>
    %cst_46 = arith.constant 5.000000e-01 : f32
    %115 = vector.broadcast %cst_46 : f32 to vector<8x512xf32>
    %116 = arith.mulf %115, %114 : vector<8x512xf32>
    %cst_47 = arith.constant 0.707106769 : f32
    %117 = vector.broadcast %cst_47 : f32 to vector<8x512xf32>
    %118 = arith.mulf %114, %117 : vector<8x512xf32>
    %119 = math.erf %118 : vector<8x512xf32>
    %cst_48 = arith.constant 1.000000e+00 : f32
    %120 = vector.broadcast %cst_48 : f32 to vector<8x512xf32>
    %121 = arith.addf %120, %119 : vector<8x512xf32>
    %122 = arith.mulf %116, %121 : vector<8x512xf32>
    %123 = arith.truncf %122 : vector<8x512xf32> to vector<8x512xbf16>
    %c0_49 = arith.constant 0 : index
    %c0_50 = arith.constant 0 : index
    %c0_51 = arith.constant 0 : index
    %124 = vector.load %arg5[%c0_49, %c0_50, %c0_51] : memref<1x512x128xbf16, #tpu.memory_space<vmem>>, vector<1x512x128xbf16>
    %125 = vector.shape_cast %124 : vector<1x512x128xbf16> to vector<512x128xbf16>
    %cst_52 = arith.constant dense<0.000000e+00> : vector<8x128xf32>
    %126 = tpu.matmul %123, %125, %cst_52 {dimension_numbers = #tpu.dot_dimension_numbers<[1], [0], [0], [1], [0, 0, 1, 1], [], []>} : vector<8x512xbf16>, vector<512x128xbf16>, vector<8x128xf32> -> vector<8x128xf32>
    %127 = vector.broadcast %10 : vector<1x128xf32> to vector<8x128xf32>
    %128 = arith.addf %126, %127 : vector<8x128xf32>
    %129 = arith.addf %128, %86 : vector<8x128xf32>
    %c0_53 = arith.constant 0 : index
    %c0_54 = arith.constant 0 : index
    %130 = vector.load %arg8[%c0_53, %c0_54] : memref<8x128xf32, #tpu.memory_space<vmem>>, vector<8x128xf32>
    tpu.vector_store %arg8[%c0_53, %c0_54], %129 {strides = array<i32>} : memref<8x128xf32, #tpu.memory_space<vmem>>, vector<8x128xf32>,
    %c2_i32 = arith.constant 2 : i32
    %131 = arith.cmpi eq, %arg0, %c2_i32 : i32
    %132 = arith.extui %131 : i1 to i32
    %c0_i32_55 = arith.constant 0 : i32
    %133 = arith.cmpi ne, %132, %c0_i32_55 : i32
    scf.if %133 {
      %c0_56 = arith.constant 0 : index
      %c0_57 = arith.constant 0 : index
      %134 = vector.load %arg7[%c0_56, %c0_57] : memref<8x128xf32, #tpu.memory_space<vmem>>, vector<8x128xf32>
      tpu.vector_store %arg7[%c0_56, %c0_57], %129 {strides = array<i32>} : memref<8x128xf32, #tpu.memory_space<vmem>>, vector<8x128xf32>,
    } else {
    }
    return
  }
  func.func @transform_0(%arg0: i32) -> (i32, i32) {
    %c0_i32 = arith.constant 0 : i32
    %c0_i32_0 = arith.constant 0 : i32
    %c0_i32_1 = arith.constant 0 : i32
    return %c0_i32, %c0_i32_0 : i32, i32
  }
  func.func @transform_1(%arg0: i32) -> (i32, i32, i32) {
    %c0_i32 = arith.constant 0 : i32
    %c0_i32_0 = arith.constant 0 : i32
    %c0_i32_1 = arith.constant 0 : i32
    return %arg0, %c0_i32, %c0_i32_0 : i32, i32, i32
  }
  func.func @transform_2(%arg0: i32) -> (i32, i32, i32) {
    %c0_i32 = arith.constant 0 : i32
    %c0_i32_0 = arith.constant 0 : i32
    %c0_i32_1 = arith.constant 0 : i32
    return %arg0, %c0_i32, %c0_i32_0 : i32, i32, i32
  }
  func.func @transform_3(%arg0: i32) -> (i32, i32, i32) {
    %c0_i32 = arith.constant 0 : i32
    %c0_i32_0 = arith.constant 0 : i32
    %c0_i32_1 = arith.constant 0 : i32
    return %arg0, %c0_i32, %c0_i32_0 : i32, i32, i32
  }
  func.func @transform_4(%arg0: i32) -> (i32, i32, i32) {
    %c0_i32 = arith.constant 0 : i32
    %c0_i32_0 = arith.constant 0 : i32
    %c0_i32_1 = arith.constant 0 : i32
    return %arg0, %c0_i32, %c0_i32_0 : i32, i32, i32
  }
  func.func @transform_5(%arg0: i32) -> (i32, i32, i32) {
    %c0_i32 = arith.constant 0 : i32
    %c0_i32_0 = arith.constant 0 : i32
    %c0_i32_1 = arith.constant 0 : i32
    return %arg0, %c0_i32, %c0_i32_0 : i32, i32, i32
  }
  func.func @transform_6(%arg0: i32) -> (i32, i32) {
    %c0_i32 = arith.constant 0 : i32
    %c0_i32_0 = arith.constant 0 : i32
    %c0_i32_1 = arith.constant 0 : i32
    return %c0_i32, %c0_i32_0 : i32, i32
  }
}

</mosaic_0001>

<bundles_post_ra>
// kernel: tpu_custom_call.1
= control target key start
LH: loop header
LB: loop body
LE: loop exit
PB: predicated region body
PF: predicated region fallthrough
CT: control target
= control target key end

     0   :  { %s3463_s0 = inlined_call_operand.hbm [shape: f32[8,128], index: 0, kind: input, shape index: {}]   ;;  %s3464_s1 = inlined_call_operand.hbm [shape: bf16[3,128,384], index: 1, kind: input, shape index: {}]   ;;  %s3465_s2 = inlined_call_operand.hbm [shape: bf16[3,128,128], index: 2, kind: input, shape index: {}]   ;;  %s3466_s3 = inlined_call_operand.hbm [shape: bf16[3,128,512], index: 3, kind: input, shape index: {}]   ;;  %s3467_s4 = inlined_call_operand.hbm [shape: bf16[3,512,128], index: 4, kind: input, shape index: {}]   ;;  %s3468_s5 = inlined_call_operand.hbm [shape: f32[3,8,512], index: 5, kind: input, shape index: {}]   ;;  %s3469_s6 = inlined_call_operand.hbm [shape: f32[8,128], index: 6, kind: output, shape index: {}]  }
   0x1   :  { %3473 = sst [smem:[#allocation24_spill]] %s3463_s0 }
   0x2   :  { %3474 = sst [smem:[#allocation25_spill]] %s3464_s1 }
   0x3   :  { %3475 = sst [smem:[#allocation26_spill]] %s3466_s3 }
   0x4   :  { %11 = vsyncpa [#allocation5], 0 }
   0x5   :  { %12 = vsyncpa [#allocation8], 0 }
   0x6   :  { %14 = vsyncpa [#allocation8 + $0x1], 0 }
   0x7   :  { %15 = vsyncpa [#allocation11], 0 }
   0x8   :  { %17 = vsyncpa [#allocation11 + $0x1], 0 }
   0x9   :  { %18 = vsyncpa [#allocation14], 0 }
   0xa   :  { %20 = vsyncpa [#allocation14 + $0x1], 0 }
   0xb   :  { %21 = vsyncpa [#allocation6], 0  ;;  %s2908_s21 = smov 0   ;;  %s2910_s22 = smov 0  }
   0xc   :  { %s2912_s23 = smov 0   ;;  %s2914_s24 = smov 0  }
   0xd LB: > { %3476 = sst [smem:[#allocation21_spill]] %s2855_s23  ;;  %s2929_s25 = sadd.s32 1, %s2859_s24   ;;  %s2859_s24 = sphi %s2914_s24, %s3486_s24   ;;  %s2855_s23 = sphi %s2912_s23, %s3488_s23   ;;  %s2851_s22 = sphi %s2910_s22, %s3490_s22   ;;  %s2847_s21 = sphi %s2908_s21, %s3489_s21  }
   0xe   : > { %3477 = sst [smem:[#allocation22_spill]] %s2929_s25  ;;  %s55_s26 = sadd.s32 1, %s2855_s23 }
   0xf   : > { %s52_s27 = ssub.s32 %s2859_s24, %s2929_s25  ;;  %p62_p0 = scmp.ne.s32.totalorder %s2855_s23, %s2851_s22 }
  0x10   : > { %p53_p1 = scmp.eq.s32.totalorder %s52_s27, 0  ;;  %p63_p2 = scmp.eq.s32.totalorder %s2859_s24, 0 }
  0x11   : > { %p2524_p3 = scmp.lt.s32.totalorder %s2859_s24, 3  ;;  %s229_s29 = sand.u32 1, %s2859_s24  }
  0x12   : > { %s2939_s28 = scalar_select %p53_p1, %s2855_s23, %s55_s26  }
  0x13   : > { %p64_p4 = por %p63_p2, %p62_p0  ;;  %s2943_s30 = sand.u32 1, %s2855_s23  }
  0x14   : > { %3478 = sst [smem:[#allocation23_spill]] %s2939_s28  ;;  %s2482_s7 = smul.u32 192, %s2943_s30 }
  0x15   : > { %p2946_p5 = pnand %p2524_p3, %p64_p4  ;;  %s2483_s9 = smul.u32 192, %s2859_s24 }
  0x16   : > { %s3480_s1 = sld [smem:[#allocation25_spill]]  ;;  %s233_s13 = scalar_lea.vmem [#allocation7], %s2482_s7 }
  0x17   : > { %s241_s14 = sshll.u32 %s233_s13, 4  ;;  %s2956_s16 = scalar_lea.sflag [#allocation8], %s229_s29  ;;  %s242_s14 = int_to_ptr.vmem [resolvable:$true] %s241_s14 }
  0x18   : > { %p2960_p7 = pneg %p2946_p5 }
  0x1c   : > { %s238_s12 = scalar_lea.hbm %s3480_s1, %s2483_s9  ;;  %s2608_s27 = scalar_lea.hbm %s3480_s1, 576 }
  0x1d   : > { %s239_s15 = sshll.u32 %s238_s12, 4  ;;  %s240_s15 = int_to_ptr.hbm [resolvable:$true] %s239_s15 }
  0x1e   : > { %s2601_s17 = sshra.s32 %s240_s15, 4  ;;  %s2602_s17 = int_to_ptr.hbm [resolvable:$true] %s2601_s17 }
  0x1f   : > { %s2603_s18 = scalar_lea.hbm %s2602_s17, 192  ;;  %p2609_p10 = scmp.lt.s32.totalorder %s2602_s17, %s3480_s1 }
  0x20   : > { %p2604_p6 = scmp.ne.s32.totalorder %s2602_s17, %s2603_s18  ;;  %p2610_p11 = scmp.lt.s32.totalorder %s2608_s27, %s2603_s18 }
  0x22   : > { %p2606_p8 = pnand %p2960_p7, %p2604_p6  ;;  %p2611_p12 = por %p2610_p11, %p2609_p10 }
  0x24   : > { %p2607_p9 = pneg %p2606_p8 }
  0x26   : > { %p2612_p13 = pnand %p2611_p12, %p2607_p9 }
  0x28   : > { %2615 = shalt.err (!%p2612_p13)
}
  0x29   : > { %s2861_s10 = smov 192   ;;  %s2862_s11 = smov 12  }
  0x2a   : > { %2510 = dma.hbm_to_vmem [thread:$0]  (!%p2946_p5), %s240_s15, 3072, %s242_s14, %s2956_s16, %s2861_s10, %s2861_s10, %s2862_s11  }
  0x2b   : > { %s1961_s12 = sshll.u32 %s2943_s30, 8  ;;  %s2383_s13 = sshll.u32 %s2859_s24, 8 }
  0x2c   : > { %s3482_s3 = sld [smem:[#allocation26_spill]]  ;;  %s277_s18 = scalar_lea.vmem [#allocation10], %s1961_s12 }
  0x2d   : > { %s285_s27 = sshll.u32 %s277_s18, 4  ;;  %s2982_s9 = scalar_lea.sflag [#allocation11], %s229_s29  ;;  %s286_s27 = int_to_ptr.vmem [resolvable:$true] %s285_s27 }
  0x32   : > { %s282_s17 = scalar_lea.hbm %s3482_s3, %s2383_s13  ;;  %s2638_s10 = scalar_lea.hbm %s3482_s3, 768 }
  0x33   : > { %s283_s7 = sshll.u32 %s282_s17, 4  ;;  %s284_s7 = int_to_ptr.hbm [resolvable:$true] %s283_s7 }
  0x34   : > { %s2631_s1 = sshra.s32 %s284_s7, 4  ;;  %s2632_s1 = int_to_ptr.hbm [resolvable:$true] %s2631_s1 }
  0x35   : > { %s2633_s28 = scalar_lea.hbm %s2632_s1, 256  ;;  %p2639_p3 = scmp.lt.s32.totalorder %s2632_s1, %s3482_s3 }
  0x36   : > { %p2634_p0 = scmp.ne.s32.totalorder %s2632_s1, %s2633_s28  ;;  %p2640_p4 = scmp.lt.s32.totalorder %s2638_s10, %s2633_s28 }
  0x38   : > { %p2636_p1 = pnand %p2634_p0, %p2960_p7  ;;  %p2641_p6 = por %p2640_p4, %p2639_p3 }
  0x3a   : > { %p2637_p2 = pneg %p2636_p1 }
  0x3c   : > { %p2642_p8 = pnand %p2641_p6, %p2637_p2 }
  0x3e   : > { %2645 = shalt.err (!%p2642_p8)
}
  0x3f   : > { %s2863_s29 = smov 256   ;;  %s2864_s26 = smov 16  }
  0x40   : > { %2516 = dma.hbm_to_vmem [thread:$0]  (!%p2946_p5), %s284_s7, 4096, %s286_s27, %s2982_s9, %s2863_s29, %s2863_s29, %s2864_s26  }
  0x41   : > { %s304_s14 = scalar_lea.hbm %s3467_s4, %s2383_s13  ;;  %s299_s1 = scalar_lea.vmem [#allocation12], %s1961_s12 }
  0x42   : > { %s307_s28 = sshll.u32 %s299_s1, 4  ;;  %s305_s15 = sshll.u32 %s304_s14, 4  ;;  %s2998_s28 = int_to_ptr.vmem [resolvable:$true] %s307_s28  ;;  %s3000_s15 = int_to_ptr.hbm [resolvable:$true] %s305_s15 }
  0x43   : > { %s3003_s10 = sadd.s32 4294967295, %s2859_s24   ;;  %p68_p9 = scmp.ne.s32.totalorder %s2851_s22, %s2847_s21 }
  0x44   : > { %p69_p10 = scmp.eq.s32.totalorder %s3003_s10, 0  ;;  %p1954_p11 = scmp.ge.s32.totalorder %s2859_s24, 1 }
  0x45   : > { %p204_p12 = scmp.lt.s32.totalorder %s2859_s24, 4  ;;  %p1955_p0 = scmp.ne.s32.totalorder %s3003_s10, 0 }
  0x46   : > { %p3012_p13 = por %p69_p10, %p68_p9  ;;  %s3485_s0 = sld [smem:[#allocation24_spill]] }
  0x47   : > { %p3017_p1 = pnand %p1954_p11, %p204_p12  ;;  %s2865_s21 = smov [#allocation4]  }
  0x48   : > { %s218_s20 = sshll.u32 %s2865_s21, 4  ;;  %s1958_s29 = sshll.u32 %s2943_s30, 6  ;;  %s219_s20 = int_to_ptr.vmem [resolvable:$true] %s218_s20 }
  0x49   : > { %p2503_p2 = pneg %p3017_p1  ;;  %s2382_s26 = sshll.u32 %s2859_s24, 6 }
  0x4a   : > { %s255_s17 = scalar_lea.vmem [#allocation9], %s1958_s29  ;;  %s260_s3 = scalar_lea.hbm %s3465_s2, %s2382_s26 }
  0x4b   : > { %p2504_p3 = pnand %p2503_p2, %p69_p10  ;;  %s263_s18 = sshll.u32 %s255_s17, 4  ;;  %s264_s18 = int_to_ptr.vmem [resolvable:$true] %s263_s18 }
  0x4c   : > { %s216_s11 = sshll.u32 %s3485_s0, 4  ;;  %s261_s27 = sshll.u32 %s260_s3, 4  ;;  %s217_s11 = int_to_ptr.hbm [resolvable:$true] %s216_s11  ;;  %s262_s27 = int_to_ptr.hbm [resolvable:$true] %s261_s27 }
  0x4d   : > { %2506 = dma.hbm_to_vmem [thread:$0]  (!%p2504_p3), %s217_s11, 128, %s219_s20, [#allocation5]  }
  0x4e   : > { %s2691_s7 = sshra.s32 %s262_s27, 4  ;;  %s2698_s29 = scalar_lea.hbm %s3465_s2, 192  ;;  %s2692_s7 = int_to_ptr.hbm [resolvable:$true] %s2691_s7 }
  0x4f   : > { %s2693_s0 = scalar_lea.hbm %s2692_s7, 64  ;;  %p2699_p9 = scmp.lt.s32.totalorder %s2692_s7, %s3465_s2 }
  0x50   : > { %p2694_p4 = scmp.ne.s32.totalorder %s2692_s7, %s2693_s0  ;;  %p2700_p11 = scmp.lt.s32.totalorder %s2698_s29, %s2693_s0 }
  0x52   : > { %p2696_p6 = pnand %p2694_p4, %p2960_p7  ;;  %p2701_p12 = por %p2700_p11, %p2699_p9 }
  0x54   : > { %p2697_p8 = pneg %p2696_p6 }
  0x56   : > { %p2702_p2 = pnand %p2701_p12, %p2697_p8 }
  0x58   : > { %2705 = shalt.err (!%p2702_p2)
}
  0x59   : > { %s2866_s3 = smov 64   ;;  %s2867_s11 = smov 4  }
  0x5a   : > { %2513 = dma.hbm_to_vmem [thread:$0]  (!%p2946_p5), %s262_s27, 1024, %s264_s18, %s2956_s16, %s2866_s3, %s2866_s3, %s2867_s11  }
  0x5b   : > { %s2721_s20 = sshra.s32 %s3000_s15, 4  ;;  %s2728_s26 = scalar_lea.hbm %s3467_s4, 768  ;;  %s2722_s20 = int_to_ptr.hbm [resolvable:$true] %s2721_s20 }
  0x5c   : > { %s2723_s23 = scalar_lea.hbm %s2722_s20, 256  ;;  %p2729_p8 = scmp.lt.s32.totalorder %s2722_s20, %s3467_s4 }
  0x5d   : > { %p2724_p3 = scmp.ne.s32.totalorder %s2722_s20, %s2723_s23  ;;  %p2730_p9 = scmp.lt.s32.totalorder %s2728_s26, %s2723_s23 }
  0x5f   : > { %p2726_p4 = pnand %p2724_p3, %p2960_p7  ;;  %p2731_p11 = por %p2730_p9, %p2729_p8 }
  0x61   : > { %p2727_p6 = pneg %p2726_p4 }
  0x63   : > { %p2732_p12 = pnand %p2731_p11, %p2727_p6 }
  0x65   : > { %2735 = shalt.err (!%p2732_p12)
}
  0x66   : > { %2519 = dma.hbm_to_vmem [thread:$0]  (!%p2946_p5), %s3000_s15, 4096, %s2998_s28, %s2982_s9, %s2866_s3, %s2866_s3, %s2867_s11  }
  0x67   : > { %s1967_s16 = sshll.u32 %s2943_s30, 5  ;;  %s2385_s18 = sshll.u32 %s2859_s24, 5 }
  0x68   : > { %s326_s21 = scalar_lea.hbm %s3468_s5, %s2385_s18  ;;  %s321_s17 = scalar_lea.vmem [#allocation13], %s1967_s16 }
  0x69   : > { %s328_s29 = sshll.u32 %s326_s21, 4  ;;  %s330_s20 = sshll.u32 %s321_s17, 4  ;;  %s329_s29 = int_to_ptr.hbm [resolvable:$true] %s328_s29  ;;  %s331_s20 = int_to_ptr.vmem [resolvable:$true] %s330_s20 }
  0x6a   : > { %s318_s23 = scalar_lea.sflag [#allocation14], %s2943_s30  ;;  %s2751_s25 = sshra.s32 %s329_s29, 4  ;;  %s2752_s25 = int_to_ptr.hbm [resolvable:$true] %s2751_s25 }
  0x6b   : > { %s2753_s0 = scalar_lea.hbm %s2752_s25, 32  ;;  %s2758_s24 = scalar_lea.hbm %s3468_s5, 96 }
  0x6c   : > { %p2754_p2 = scmp.ne.s32.totalorder %s2752_s25, %s2753_s0  ;;  %p2759_p6 = scmp.lt.s32.totalorder %s2752_s25, %s3468_s5 }
  0x6d   : > { %p2760_p8 = scmp.lt.s32.totalorder %s2758_s24, %s2753_s0 }
  0x6e   : > { %p2756_p3 = pnand %p2754_p2, %p2960_p7 }
  0x6f   : > { %p2761_p9 = por %p2760_p8, %p2759_p6 }
  0x70   : > { %p2757_p4 = pneg %p2756_p3 }
  0x72   : > { %p2762_p11 = pnand %p2761_p9, %p2757_p4 }
  0x74   : > { %2765 = shalt.err (!%p2762_p11)
}
  0x75   : > { %2522 = dma.hbm_to_vmem [thread:$0]  (!%p2946_p5), %s329_s29, 512, %s331_s20, %s318_s23  }
  0x76   : > { %339 = sbr.rel (%p3017_p1) target bundleno = 1835 (0x72b), region = 44 }
  0x7b   : > { %2826 = dma.done.wait (%p69_p10), [#allocation5], 128  }
  0x7c   : > { %2828 = vsyncadd (%p69_p10), [#allocation5], 4294967168  ;;  %s346_s30 = sand.u32 1, %s3003_s10   ;;  %s348_s19 = sand.u32 1, %s2851_s22  }
  0x7d   : > { %s2484_s11 = smul.u32 192, %s348_s19  ;;  %s347_s26 = scalar_lea.sflag [#allocation8], %s346_s30 }
  0x7f   : > { %s3082_s14 = scalar_lea.vmem [#allocation7], %s2484_s11 }
  0x80   : > { %2830 = dma.done.wait (%p3012_p13), %s347_s26, 4096  }
  0x81   : > { %2832 = vsyncadd (%p3012_p13), %s347_s26, 4294963200  ;;  %s1972_s8 = sshll.u32 %s348_s19, 6  ;;  %s1973_s13 = sshll.u32 %s348_s19, 8 }
  0x82   : > { %s3088_s1 = scalar_lea.vmem [#allocation9], %s1972_s8  ;;  %s367_s16 = scalar_lea.sflag [#allocation11], %s346_s30 }
  0x83   : > { %s3090_s18 = scalar_lea.vmem [#allocation10], %s1973_s13 }
  0x84   : > { %2834 = dma.done.wait (%p3012_p13), %s367_s16, 8192  }
  0x85   : > { %2836 = vsyncadd (%p3012_p13), %s367_s16, 4294959104  ;;  %s1975_s27 = sshll.u32 %s348_s19, 5  ;;  %s3096_s7 = scalar_lea.vmem [#allocation12], %s1973_s13 }
  0x86   : > { %s387_s21 = scalar_lea.sflag [#allocation14], %s348_s19  ;;  %s3098_s29 = scalar_lea.vmem [#allocation13], %s1975_s27 }
  0x87   : > { %2838 = dma.done.wait (%p3012_p13), %s387_s21, 512  }
  0x88   : > { %2840 = vsyncadd (%p3012_p13), %s387_s21, 4294966784  ;;  %438 = sbr.rel (%p1955_p0) target bundleno = 143 (0x8f), region = 72 }
  0x8d   : > { %v439_v0 = vld [vmem:[#allocation4] sm:$0xff] }
  0x8e   : > { %440 = vst [vmem:[#allocation2] sm:$0xff] %v439_v0 }
  0x8f PF: > { %v2063_v1 = vld [vmem:[%s3082_s14 + $0xa8] sm:$0xf]  ;;  %v2408_v2 = vld [vmem:[%s3082_s14 + $0xb0] sm:$0xf0]  ;;  %v2407_v3 = vld [vmem:[%s3082_s14 + $0xac] sm:$0xf] }
  0x90   : > { %v2064_v4 = vor.u32 %v2408_v2, %v2063_v1  ;;  %v2065_v5 = vld [vmem:[%s3082_s14 + $0xb4] sm:$0xf0]  ;;  %v2051_v6 = vld [vmem:[%s3082_s14 + $0x90] sm:$0xf]  ;;  %v2405_v7 = vld [vmem:[%s3082_s14 + $0x98] sm:$0xf0] }
  0x91   : > { %v2068_v8 = vor.u32 %v2407_v3, %v2065_v5  ;;  %v2404_v9 = vld [vmem:[%s3082_s14 + $0x94] sm:$0xf]  ;;  %v2053_v10 = vld [vmem:[%s3082_s14 + $0x9c] sm:$0xf0]  ;;  %v2052_v11 = vor.u32 %v2405_v7, %v2051_v6  ;;  %v2039_v13 = vld [vmem:[%s3082_s14 + $0x78] sm:$0xf] }
  0x92   : > { %610 = vmatpush.bf16.msra.mxu0 %v2064_v4  ;;  %v2056_v12 = vor.u32 %v2404_v9, %v2053_v10  ;;  %v2402_v14 = vld [vmem:[%s3082_s14 + $0x80] sm:$0xf0]  ;;  %v2401_v15 = vld [vmem:[%s3082_s14 + $0x7c] sm:$0xf]  ;;  %v2041_v16 = vld [vmem:[%s3082_s14 + $0x84] sm:$0xf0] }
  0x93   : > { %623 = vmatpush.bf16.msra.mxu1 %v2068_v8  ;;  %v2040_v17 = vor.u32 %v2402_v14, %v2039_v13  ;;  %v2044_v18 = vor.u32 %v2401_v15, %v2041_v16  ;;  %v2027_v19 = vld [vmem:[%s3082_s14 + $0x60] sm:$0xf]  ;;  %v2399_v20 = vld [vmem:[%s3082_s14 + $0x68] sm:$0xf0]  ;;  %v2398_v21 = vld [vmem:[%s3082_s14 + $0x64] sm:$0xf] }
  0x94   : > { %v2029_v22 = vld [vmem:[%s3082_s14 + $0x6c] sm:$0xf0]  ;;  %v2028_v23 = vor.u32 %v2399_v20, %v2027_v19  ;;  %v2015_v25 = vld [vmem:[%s3082_s14 + $0x48] sm:$0xf]  ;;  %v2396_v26 = vld [vmem:[%s3082_s14 + $0x50] sm:$0xf0] }
  0x95   : > { %v2032_v24 = vor.u32 %v2398_v21, %v2029_v22  ;;  %v2395_v27 = vld [vmem:[%s3082_s14 + $0x4c] sm:$0xf]  ;;  %v2017_v28 = vld [vmem:[%s3082_s14 + $0x54] sm:$0xf0]  ;;  %v2016_v29 = vor.u32 %v2396_v26, %v2015_v25  ;;  %v2003_v31 = vld [vmem:[%s3082_s14 + $0x30] sm:$0xf] }
  0x96   : > { %611 = vmatpush.bf16.msra.mxu0 %v2052_v11  ;;  %v2020_v30 = vor.u32 %v2395_v27, %v2017_v28  ;;  %v2393_v32 = vld [vmem:[%s3082_s14 + $0x38] sm:$0xf0]  ;;  %v2392_v33 = vld [vmem:[%s3082_s14 + $0x34] sm:$0xf]  ;;  %v2005_v34 = vld [vmem:[%s3082_s14 + $0x3c] sm:$0xf0] }
  0x97   : > { %624 = vmatpush.bf16.msra.mxu1 %v2056_v12  ;;  %v2004_v35 = vor.u32 %v2393_v32, %v2003_v31  ;;  %v2008_v36 = vor.u32 %v2392_v33, %v2005_v34  ;;  %v1991_v37 = vld [vmem:[%s3082_s14 + $0x18] sm:$0xf]  ;;  %v2390_v38 = vld [vmem:[%s3082_s14 + $0x20] sm:$0xf0]  ;;  %v2389_v39 = vld [vmem:[%s3082_s14 + $0x1c] sm:$0xf] }
  0x98   : > { %v1993_v40 = vld [vmem:[%s3082_s14 + $0x24] sm:$0xf0]  ;;  %v1992_v41 = vor.u32 %v2390_v38, %v1991_v37  ;;  %v1979_v43 = vld [vmem:[%s3082_s14] sm:$0xf]  ;;  %v2387_v44 = vld [vmem:[%s3082_s14 + $0x8] sm:$0xf0] }
  0x99   : > { %v1996_v42 = vor.u32 %v2389_v39, %v1993_v40  ;;  %v2386_v45 = vld [vmem:[%s3082_s14 + $0x4] sm:$0xf]  ;;  %v1981_v46 = vld [vmem:[%s3082_s14 + $0xc] sm:$0xf0]  ;;  %v1980_v47 = vor.u32 %v2387_v44, %v1979_v43  ;;  %v3138_v48 = vld [vmem:[#allocation2] sm:$0xff]  ;;  %vm654_vm0 = vcmask 261120  }
  0x9a   : > { %612 = vmatpush.bf16.msra.mxu0 %v2040_v17  ;;  %v1984_v49 = vor.u32 %v2386_v45, %v1981_v46  ;;  %v3142_v50 = vpack.c.bf16 %v3138_v48, %v3138_v48  ;;  %v3147_v51 = vld [vmem:[%s3098_s29 + $0x8] sm:$0xff]  ;;  %v3150_v52 = vld [vmem:[%s3098_s29] sm:$0xff]  ;;  %s2868_s12 = smov 32   ;;  %s2869_s17 = smov 64   ;;  %v2071_v61 = vld [vmem:[%s3082_s14 + $0xb0] sm:$0xf] }
  0x9b   : > { %625 = vmatpush.bf16.msra.mxu1 %v2044_v18  ;;  %v480_v53 = vperm.slane %v3147_v51, 0  ;;  %v479_v54 = vperm.slane %v3150_v52, 0  ;;  %s2870_s20 = smov 96   ;;  %v2409_v62 = vld [vmem:[%s3082_s14 + $0xb8] sm:$0xf0]  ;;  %v649_v18 = vlaneseq  ;;  %vm773_vm2 = vcmask 64512  }
  0x9c   : > { %v2059_v63 = vld [vmem:[%s3082_s14 + $0x98] sm:$0xf]  ;;  %v2072_v0 = vor.u32 %v2409_v62, %v2071_v61  ;;  %v2406_v1 = vld [vmem:[%s3082_s14 + $0xa0] sm:$0xf0]  ;;  %v2047_v3 = vld [vmem:[%s3082_s14 + $0x80] sm:$0xf] }
  0x9d   : > { %v2060_v2 = vor.u32 %v2406_v1, %v2059_v63  ;;  %v2403_v4 = vld [vmem:[%s3082_s14 + $0x88] sm:$0xf0]  ;;  %v2035_v8 = vld [vmem:[%s3082_s14 + $0x68] sm:$0xf]  ;;  %v2400_v9 = vld [vmem:[%s3082_s14 + $0x70] sm:$0xf0] }
  0x9e   : > { %613 = vmatpush.bf16.msra.mxu0 %v2028_v23  ;;  %636 = vmatpush.bf16.msra.mxu2 %v2072_v0  ;;  %v2048_v7 = vor.u32 %v2403_v4, %v2047_v3  ;;  %v2036_v10 = vor.u32 %v2400_v9, %v2035_v8  ;;  %v2023_v11 = vld [vmem:[%s3082_s14 + $0x50] sm:$0xf]  ;;  %v2397_v12 = vld [vmem:[%s3082_s14 + $0x58] sm:$0xf0]  ;;  %v2011_v16 = vld [vmem:[%s3082_s14 + $0x38] sm:$0xf] }
  0x9f   : > { %626 = vmatpush.bf16.msra.mxu1 %v2032_v24  ;;  %v2024_v14 = vor.u32 %v2397_v12, %v2023_v11  ;;  %v2394_v17 = vld [vmem:[%s3082_s14 + $0x40] sm:$0xf0]  ;;  %v1999_v20 = vld [vmem:[%s3082_s14 + $0x20] sm:$0xf]  ;;  %v2391_v21 = vld [vmem:[%s3082_s14 + $0x28] sm:$0xf0] }
  0xa0   : > { %v2012_v19 = vor.u32 %v2394_v17, %v2011_v16  ;;  %v650_v23 = vshrl.u32 %v649_v18, 7  ;;  %v652_v24 = vand.u32 127, %v649_v18  ;;  %v2000_v25 = vor.u32 %v2391_v21, %v1999_v20  ;;  %v1987_v26 = vld [vmem:[%s3082_s14 + $0x8] sm:$0xf]  ;;  %v2388_v27 = vld [vmem:[%s3082_s14 + $0x10] sm:$0xf0] }
  0xa1   : > { %vm873_vm3 = vcmask 523520   ;;  %vm905_vm4 = vcmask 785920   ;;  %vm937_vm5 = vcmask 1048320   ;;  %p2377_p5 = scmp.ne.s32.totalorder %s3003_s10, 2 }
  0xa2   : > { %614 = vmatpush.bf16.msra.mxu0 %v2016_v29  ;;  %637 = vmatpush.bf16.msra.mxu2 %v2060_v2  ;;  %vm653_vm1 = vcmp.gt.s32.totalorder %v652_v24, %v650_v23  ;;  %v1988_v29 = vor.u32 %v2388_v27, %v1987_v26 }
  0xa3   : > { %627 = vmatpush.bf16.msra.mxu1 %v2020_v30 }
  0xa6   : > { %615 = vmatpush.bf16.msra.mxu0 %v2004_v35  ;;  %638 = vmatpush.bf16.msra.mxu2 %v2048_v7 }
  0xa7   : > { %628 = vmatpush.bf16.msra.mxu1 %v2008_v36 }
  0xaa   : > { %616 = vmatpush.bf16.msra.mxu0 %v1992_v41  ;;  %639 = vmatpush.bf16.msra.mxu2 %v2036_v10 }
  0xab   : > { %629 = vmatpush.bf16.msra.mxu1 %v1996_v42 }
  0xae   : > { %617 = vmatpush.bf16.msra.mxu0 %v1980_v47  ;;  %640 = vmatpush.bf16.msra.mxu2 %v2024_v14 }
  0xaf   : > { %630 = vmatpush.bf16.msra.mxu1 %v1984_v49 }
  0xb1   : > { %618 = vmatmul.bf16.vlgmr.msra.gmra.mxu0 %v3142_v50 }
  0xb2   : > { %631 = vmatmul.bf16.vlgmr.msra.gmra.mxu1 %v3142_v50  ;;  %641 = vmatpush.bf16.msra.mxu2 %v2012_v19 }
  0xb6   : > { %642 = vmatpush.bf16.msra.mxu2 %v2000_v25 }
  0xba   : > { %643 = vmatpush.bf16.msra.mxu2 %v1988_v29  ;;  %v2417_v29 = vld [vmem:[%s3088_s1 + $0x38] sm:$0xff] }
  0xbd   : > { %644 = vmatmul.bf16.vlgmr.msra.gmra.mxu2 %v3142_v50 }
  0xbe   : > { %1006 = vmatpush.bf16.msrb.mxu2 %v2417_v29 }
 0x12e   : > { %v619_v55 = vpop.f32.mrf.mxu0 }
 0x12f   : > { %v632_v56 = vpop.f32.mrf.mxu1  ;;  %v620_v58 = vadd.f32 %v619_v55, %v479_v54  ;;  %v3195_v54 = vld [vmem:[%s3098_s29 + $0x10] sm:$0xff] }
 0x130   : > { %v633_v57 = vadd.f32 %v632_v56, %v480_v53  ;;  %v481_v55 = vperm.slane %v3195_v54, 0 }
 0x132   : > { %745 = vrot.lane.b32.xlu2 %v633_v57, %s2868_s12  ;;  %715 = vrot.lane.b32.xlu1 %v633_v57, %s2869_s17 }
 0x133   : > { %685 = vrot.lane.b32.xlu0 %v633_v57, %s2870_s20  ;;  %2073 = vmatpush.xpose.msk.msra.mxu3 %vm654_vm0, %v633_v57 }
 0x136   : > { %2074 = vmatmul.msk.f32.vlgmr.msra.gmra.mxu3 %vm654_vm0, %v620_v58  ;;  %v621_v59 = vpop.f32.mrf.mxu0 }
 0x137   : > { %v634_v60 = vpop.f32.mrf.mxu1 }
 0x13a   : > { %743 = vrot.lane.b32.xlu2 %v620_v58, %s2868_s12  ;;  %713 = vrot.lane.b32.xlu1 %v620_v58, %s2869_s17 }
 0x13b   : > { %683 = vrot.lane.b32.xlu0 %v620_v58, %s2870_s20 }
 0x140   : > { %v645_v56 = vpop.f32.mrf.mxu2 }
 0x141   : > { %v646_v57 = vadd.f32 %v645_v56, %v481_v55  ;;  %v2233_v56 = vld [vmem:[%s3090_s18 + $0xf0] sm:$0xf0] }
 0x148   : > { %v647_v58 = vpop.f32.mrf.mxu2 }
 0x149   : > { %v2449_v58 = vld [vmem:[%s3090_s18 + $0xf4] sm:$0xf0] }
 0x18c   : > { %v746_v15 = vpop.permute.xlu2 %745 }
 0x194   : > { %v744_v32 = vpop.permute.xlu2 %743 }
 0x1a4   : > { %v716_v5 = vpop.permute.xlu1 %715 }
 0x1a5   : > { %v686_v6 = vpop.permute.xlu0 %685 }
 0x1a6   : > { %2075 = vmatpush.xpose.msk.msrb.mxu3 %vm654_vm0, %v686_v6 }
 0x1aa   : > { %2077 = vmatpush.xpose.msk.msra.mxu3 %vm654_vm0, %v716_v5 }
 0x1ac   : > { %v714_v22 = vpop.permute.xlu1 %713 }
 0x1ad   : > { %v684_v13 = vpop.permute.xlu0 %683 }
 0x1ae   : > { %2076 = vmatmul.msk.f32.vlgmr.msrb.gmra.mxu3 %vm654_vm0, %v684_v13 }
 0x1af   : > { %2079 = vmatpush.xpose.msk.msrb.mxu3 %vm654_vm0, %v746_v15 }
 0x1b6   : > { %2078 = vmatmul.msk.f32.vlgmr.msra.gmra.mxu3 %vm654_vm0, %v714_v22 }
 0x1b7   : > { %836 = vmatpush.msra.mxu3 %v646_v57 }
 0x1b9   : > { %v678_v28 = vpop.f32.mrf.mxu3 }
 0x1ba   : > { %v681_v30 = vmul.f32 0.17677669, %v678_v28 }
 0x1bc   : > { %v682_v31 = vsel %vm653_vm1, -1e+30, %v681_v30  ;;  %v2416_v30 = vld [vmem:[%s3088_s1 + $0x30] sm:$0xff] }
 0x1bd   : > { %v774_v33 = vsel %vm773_vm2, %v682_v31, -inf  ;;  %1007 = vmatpush.bf16.msrb.mxu2 %v2416_v30  ;;  %v2439_v30 = vld [vmem:[%s3090_s18 + $0xac] sm:$0xf] }
 0x1be   : > { %2080 = vmatmul.msk.f32.vlgmr.msrb.gmra.mxu3 %vm654_vm0, %v744_v32  ;;  %775 = vmax.xlane.f32.xlu0 %v774_v33  ;;  %v2414_v32 = vld [vmem:[%s3088_s1 + $0x20] sm:$0xff]  ;;  %v2413_v33 = vld [vmem:[%s3088_s1 + $0x18] sm:$0xff] }
 0x231   : > { %v708_v34 = vpop.f32.mrf.mxu3  ;;  %v776_v35 = vpop.xlane.xlu0 %775 }
 0x232   : > { %v711_v36 = vmul.f32 0.17677669, %v708_v34  ;;  %v786_v37 = vsub.f32 %v682_v31, %v776_v35  ;;  %v2415_v31 = vld [vmem:[%s3088_s1 + $0x28] sm:$0xff]  ;;  %v2412_v34 = vld [vmem:[%s3088_s1 + $0x10] sm:$0xff] }
 0x233   : > { %1008 = vmatpush.bf16.msrb.mxu2 %v2415_v31  ;;  %v2411_v35 = vld [vmem:[%s3088_s1 + $0x8] sm:$0xff]  ;;  %v2209_v31 = vld [vmem:[%s3090_s18 + $0xb8] sm:$0xf0] }
 0x234   : > { %v790_v38 = vmul.f32 1.442695, %v786_v37  ;;  %v712_v39 = vsel %vm653_vm1, -1e+30, %v711_v36  ;;  %v2410_v36 = vld [vmem:[%s3088_s1] sm:$0xff] }
 0x235   : > { %v777_v40 = vsel %vm773_vm2, %v712_v39, -inf }
 0x236   : > { %2572 = vpow2.f32 %v790_v38  ;;  %778 = vmax.xlane.f32.xlu1 %v777_v40 }
 0x237   : > { %1009 = vmatpush.bf16.msrb.mxu2 %v2414_v32  ;;  %v2212_v32 = vor.u32 %v2439_v30, %v2209_v31  ;;  %v2421_v30 = vld [vmem:[%s3090_s18 + $0x14] sm:$0xf0]  ;;  %v2419_v31 = vld [vmem:[%s3090_s18 + $0xc] sm:$0xf] }
 0x239   : > { %v738_v41 = vpop.f32.mrf.mxu3 }
 0x23a   : > { %v741_v42 = vmul.f32 0.17677669, %v738_v41 }
 0x23b   : > { %1010 = vmatpush.bf16.msrb.mxu2 %v2413_v33  ;;  %v2183_v33 = vld [vmem:[%s3090_s18 + $0x80] sm:$0xf] }
 0x23c   : > { %v2573_v43 = vpop.eup %2572  ;;  %v742_v44 = vsel %vm653_vm1, -1e+30, %v741_v42  ;;  %v957_v42 = vperm.slane %v3150_v52, 1 }
 0x23d   : > { %v780_v45 = vsel %vm773_vm2, %v742_v44, -inf  ;;  %v798_v46 = vsel %vm773_vm2, %v2573_v43, 0.0 }
 0x23e   : > { %781 = vmax.xlane.f32.xlu2 %v780_v45  ;;  %799 = vadd.xlane.f32.xlu0 %v798_v46 }
 0x23f   : > { %1011 = vmatpush.bf16.msrb.mxu2 %v2412_v34  ;;  %v2436_v34 = vld [vmem:[%s3090_s18 + $0x8c] sm:$0xf0] }
 0x241   : > { %v768_v47 = vpop.f32.mrf.mxu3 }
 0x242   : > { %v771_v49 = vmul.f32 0.17677669, %v768_v47  ;;  %v2871_v47 = vmov 128.0  }
 0x243   : > { %1012 = vmatpush.bf16.msrb.mxu2 %v2411_v35  ;;  %v2434_v35 = vld [vmem:[%s3090_s18 + $0x84] sm:$0xf] }
 0x244   : > { %v772_v50 = vsel %vm653_vm1, -1e+30, %v771_v49  ;;  %v2231_v49 = vld [vmem:[%s3090_s18 + $0xe0] sm:$0xf] }
 0x245   : > { %v783_v53 = vsel %vm773_vm2, %v772_v50, -inf }
 0x246   : > { %784 = vmax.xlane.f32.xlu2 %v783_v53  ;;  %v2446_v53 = vld [vmem:[%s3090_s18 + $0xe4] sm:$0xf] }
 0x247   : > { %1013 = vmatpush.bf16.msrb.mxu2 %v2410_v36  ;;  %v2184_v36 = vor.u32 %v2436_v34, %v2183_v33  ;;  %v2129_v33 = vld [vmem:[%s3090_s18 + $0x18] sm:$0xf0] }
 0x248   : > { %v2132_v34 = vor.u32 %v2419_v31, %v2129_v33 }
 0x2a9   : > { %v779_v59 = vpop.xlane.xlu1 %778 }
 0x2aa   : > { %v787_v60 = vsub.f32 %v712_v39, %v779_v59  ;;  %v2236_v59 = vor.u32 %v2446_v53, %v2233_v56  ;;  %v2169_v53 = vld [vmem:[%s3090_s18 + $0x70] sm:$0xf0]  ;;  %v2433_v56 = vld [vmem:[%s3090_s18 + $0x74] sm:$0xf0] }
 0x2ac   : > { %v792_v61 = vmul.f32 1.442695, %v787_v60 }
 0x2ae   : > { %2574 = vpow2.f32 %v792_v61  ;;  %v2447_v61 = vld [vmem:[%s3090_s18 + $0xec] sm:$0xf] }
 0x2b1   : > { %v782_v62 = vpop.xlane.xlu2 %781  ;;  %v800_v63 = vpop.xlane.xlu0 %799 }
 0x2b2   : > { %v788_v0 = vsub.f32 %v742_v44, %v782_v62  ;;  %2576 = vrcp.f32 %v800_v63  ;;  %v2241_v62 = vld [vmem:[%s3090_s18 + $0xf8] sm:$0xf0] }
 0x2b3   : > { %v2244_v63 = vor.u32 %v2447_v61, %v2241_v62  ;;  %v2151_v62 = vld [vmem:[%s3090_s18 + $0x40] sm:$0xf] }
 0x2b4   : > { %v2575_v1 = vpop.eup %2574  ;;  %v794_v2 = vmul.f32 1.442695, %v788_v0 }
 0x2b5   : > { %v801_v3 = vsel %vm773_vm2, %v2575_v1, 0.0  ;;  %1287 = vmatpush.bf16.msra.mxu2 %v2244_v63  ;;  %v2428_v63 = vld [vmem:[%s3090_s18 + $0x4c] sm:$0xf0] }
 0x2b6   : > { %2578 = vpow2.f32 %v794_v2  ;;  %802 = vadd.xlane.f32.xlu1 %v801_v3 }
 0x2b8   : > { %v2577_v4 = vpop.eup %2576 }
 0x2b9   : > { %v814_v5 = vmul.f32 %v2577_v4, %v2573_v43  ;;  %v785_v6 = vpop.xlane.xlu2 %784 }
 0x2ba   : > { %v789_v7 = vsub.f32 %v772_v50, %v785_v6  ;;  %v2448_v50 = vld [vmem:[%s3090_s18 + $0xec] sm:$0xf0] }
 0x2bb   : > { %2081 = vmatmul.msk.f32.vlgmr.msra.gmra.mxu3 %vm773_vm2, %v814_v5  ;;  %v2232_v55 = vor.u32 %v2448_v50, %v2231_v49  ;;  %v2430_v49 = vld [vmem:[%s3090_s18 + $0x64] sm:$0xf] }
 0x2bc   : > { %v2579_v8 = vpop.eup %2578  ;;  %v796_v9 = vmul.f32 1.442695, %v789_v7 }
 0x2bd   : > { %v804_v10 = vsel %vm773_vm2, %v2579_v8, 0.0 }
 0x2be   : > { %2580 = vpow2.f32 %v796_v9  ;;  %805 = vadd.xlane.f32.xlu2 %v804_v10  ;;  %v2215_v9 = vld [vmem:[%s3090_s18 + $0xc0] sm:$0xf]  ;;  %v2444_v10 = vld [vmem:[%s3090_s18 + $0xcc] sm:$0xf0] }
 0x2c4   : > { %v2581_v11 = vpop.eup %2580 }
 0x2c5   : > { %v807_v12 = vsel %vm773_vm2, %v2581_v11, 0.0 }
 0x2c6   : > { %808 = vadd.xlane.f32.xlu0 %v807_v12  ;;  %v2216_v12 = vor.u32 %v2444_v10, %v2215_v9  ;;  %v2161_v9 = vld [vmem:[%s3090_s18 + $0x58] sm:$0xf0] }
 0x2cf   : > { %843 = vrot.lane.b32.xlu1 %v646_v57, %s2870_s20 }
 0x2d6   : > { %875 = vrot.lane.b32.xlu2 %v646_v57, %s2869_s17 }
 0x2da   : > { %907 = vrot.lane.b32.xlu0 %v646_v57, %s2868_s12  ;;  %v2239_v57 = vld [vmem:[%s3090_s18 + $0xe8] sm:$0xf] }
 0x2db   : > { %v2240_v60 = vor.u32 %v2449_v58, %v2239_v57  ;;  %v2172_v57 = vor.u32 %v2430_v49, %v2169_v53  ;;  %v1049_v49 = vperm.slane %v3150_v52, 3 }
 0x329   : > { %v803_v14 = vpop.xlane.xlu1 %802 }
 0x331   : > { %v806_v13 = vpop.xlane.xlu2 %805 }
 0x332   : > { %2582 = vrcp.f32 %v806_v13  ;;  %v2217_v13 = vld [vmem:[%s3090_s18 + $0xd0] sm:$0xf0] }
 0x333   : > { %2584 = vrcp.f32 %v803_v14  ;;  %v2223_v14 = vld [vmem:[%s3090_s18 + $0xc8] sm:$0xf] }
 0x338   : > { %v2583_v15 = vpop.eup %2582 }
 0x339   : > { %v876_v16 = vpop.permute.xlu2 %875  ;;  %v816_v17 = vmul.f32 %v2583_v15, %v2579_v8  ;;  %v2585_v18 = vpop.eup %2584  ;;  %v2445_v15 = vld [vmem:[%s3090_s18 + $0xd4] sm:$0xf0] }
 0x33a   : > { %896 = vmatpush.msrb.mxu0 %v876_v16  ;;  %v809_v20 = vpop.xlane.xlu0 %808  ;;  %v815_v21 = vmul.f32 %v2585_v18, %v2575_v1  ;;  %v2443_v18 = vld [vmem:[%s3090_s18 + $0xcc] sm:$0xf] }
 0x33b   : > { %2083 = vmatmul.msk.f32.vlgmr.msrb.gmra.mxu0 %vm773_vm2, %v816_v17  ;;  %2586 = vrcp.f32 %v809_v20  ;;  %v2224_v17 = vor.u32 %v2445_v15, %v2223_v14  ;;  %v2137_v15 = vld [vmem:[%s3090_s18 + $0x30] sm:$0xf0] }
 0x33c   : > { %2588 = vrcp.f32 %v2871_v47  ;;  %1261 = vmatpush.bf16.msra.mxu0 %v2236_v59  ;;  %v2432_v47 = vld [vmem:[%s3090_s18 + $0x6c] sm:$0xf0]  ;;  %v2431_v59 = vld [vmem:[%s3090_s18 + $0x6c] sm:$0xf] }
 0x33e   : > { %v838_v19 = vpop.f32.mrf.mxu3 }
 0x33f   : > { %841 = vst.msk [vmem:[#allocation3] sm:$0xff] %vm654_vm0, %v838_v19  ;;  %v2225_v19 = vld [vmem:[%s3090_s18 + $0xd8] sm:$0xf0] }
 0x340   : > { %v2228_v20 = vor.u32 %v2443_v18, %v2225_v19 }
 0x341   : > { %v844_v22 = vpop.permute.xlu1 %843  ;;  %v2587_v23 = vpop.eup %2586 }
 0x342   : > { %864 = vmatpush.msrb.mxu3 %v844_v22  ;;  %v817_v25 = vmul.f32 %v2587_v23, %v2581_v11  ;;  %v2442_v11 = vld [vmem:[%s3090_s18 + $0xc4] sm:$0xf]  ;;  %v2440_v22 = vld [vmem:[%s3090_s18 + $0xac] sm:$0xf0]  ;;  %1288 = vmatpush.bf16.msra.mxu2 %v2228_v20  ;;  %v2423_v20 = vld [vmem:[%s3090_s18 + $0x2c] sm:$0xf] }
 0x343   : > { %2082 = vmatmul.msk.f32.vlgmr.msrb.gmra.mxu3 %vm773_vm2, %v815_v21  ;;  %v2220_v16 = vor.u32 %v2442_v11, %v2217_v13  ;;  %v2199_v21 = vld [vmem:[%s3090_s18 + $0xa0] sm:$0xf]  ;;  %v2438_v23 = vld [vmem:[%s3090_s18 + $0xa4] sm:$0xf] }
 0x344   : > { %1248 = vmatpush.bf16.msra.mxu3 %v2232_v55  ;;  %v2175_v55 = vld [vmem:[%s3090_s18 + $0x68] sm:$0xf]  ;;  %v2135_v11 = vld [vmem:[%s3090_s18 + $0x20] sm:$0xf]  ;;  %v2422_v13 = vld [vmem:[%s3090_s18 + $0x24] sm:$0xf] }
 0x345   : > { %1262 = vmatpush.bf16.msra.mxu0 %v2220_v16  ;;  %v2176_v58 = vor.u32 %v2433_v56, %v2175_v55  ;;  %v2143_v16 = vld [vmem:[%s3090_s18 + $0x28] sm:$0xf]  ;;  %v2140_v18 = vor.u32 %v2422_v13, %v2137_v15  ;;  %v1085_v55 = vperm.slane %v3147_v51, 5  ;;  %v1086_v56 = vperm.slane %v3195_v54, 5  ;;  %v2473_v54 = vld [vmem:[%s3096_s7 + $0xb8] sm:$0xff] }
 0x346   : > { %1289 = vmatpush.bf16.msra.mxu2 %v2212_v32 }
 0x348   : > { %1249 = vmatpush.bf16.msra.mxu3 %v2216_v12  ;;  %v2424_v12 = vld [vmem:[%s3090_s18 + $0x2c] sm:$0xf0] }
 0x349   : > { %v2136_v14 = vor.u32 %v2424_v12, %v2135_v11  ;;  %v2472_v11 = vld [vmem:[%s3096_s7 + $0xb0] sm:$0xff] }
 0x34c   : > { %v908_v24 = vpop.permute.xlu0 %907 }
 0x34d   : > { %928 = vmatpush.msrb.mxu1 %v908_v24  ;;  %v2200_v24 = vor.u32 %v2440_v22, %v2199_v21  ;;  %v2145_v21 = vld [vmem:[%s3090_s18 + $0x38] sm:$0xf0]  ;;  %v2119_v22 = vld [vmem:[%s3090_s18] sm:$0xf] }
 0x34e   : > { %2084 = vmatmul.msk.f32.vlgmr.msrb.gmra.mxu1 %vm773_vm2, %v817_v25  ;;  %v2201_v25 = vld [vmem:[%s3090_s18 + $0xb0] sm:$0xf0] }
 0x34f   : > { %1274 = vmatpush.bf16.msra.mxu1 %v2240_v60  ;;  %1250 = vmatpush.bf16.msra.mxu3 %v2200_v24  ;;  %v2177_v60 = vld [vmem:[%s3090_s18 + $0x78] sm:$0xf0]  ;;  %v2420_v24 = vld [vmem:[%s3090_s18 + $0xc] sm:$0xf0] }
 0x350   : > { %v2180_v61 = vor.u32 %v2431_v59, %v2177_v60 }
 0x353   : > { %1275 = vmatpush.bf16.msra.mxu1 %v2224_v17  ;;  %1251 = vmatpush.bf16.msra.mxu3 %v2184_v36  ;;  %v2425_v17 = vld [vmem:[%s3090_s18 + $0x34] sm:$0xf0] }
 0x354   : > { %v2144_v19 = vor.u32 %v2425_v17, %v2143_v16 }
 0x3b8   : > { %v898_v26 = vpop.f32.mrf.mxu0 }
 0x3b9   : > { %902 = vrot.lane.b32.xlu0 %v898_v26, %s2869_s17  ;;  %v2207_v26 = vld [vmem:[%s3090_s18 + $0xa8] sm:$0xf] }
 0x3c6   : > { %v866_v27 = vpop.f32.mrf.mxu3 }
 0x3c7   : > { %870 = vrot.lane.b32.xlu1 %v866_v27, %s2868_s12  ;;  %v2441_v27 = vld [vmem:[%s3090_s18 + $0xb4] sm:$0xf0] }
 0x3c8   : > { %v2208_v29 = vor.u32 %v2441_v27, %v2207_v26  ;;  %v2121_v26 = vld [vmem:[%s3090_s18 + $0x10] sm:$0xf0]  ;;  %v2120_v27 = vor.u32 %v2420_v24, %v2119_v22 }
 0x3ca   : > { %1276 = vmatpush.bf16.msra.mxu1 %v2208_v29  ;;  %v2127_v29 = vld [vmem:[%s3090_s18 + $0x8] sm:$0xf] }
 0x3cb   : > { %v930_v28 = vpop.f32.mrf.mxu1  ;;  %v2128_v32 = vor.u32 %v2421_v30, %v2127_v29  ;;  %v2471_v29 = vld [vmem:[%s3096_s7 + $0xa8] sm:$0xff] }
 0x3cc   : > { %934 = vrot.lane.b32.xlu2 %v930_v28, %s2870_s20  ;;  %v2204_v28 = vor.u32 %v2438_v23, %v2201_v25  ;;  %v2148_v23 = vor.u32 %v2423_v20, %v2145_v21  ;;  %v2418_v25 = vld [vmem:[%s3090_s18 + $0x4] sm:$0xf]  ;;  %v2457_v20 = vld [vmem:[%s3096_s7 + $0x38] sm:$0xff] }
 0x3ce   : > { %1263 = vmatpush.bf16.msra.mxu0 %v2204_v28  ;;  %v2124_v28 = vor.u32 %v2418_v25, %v2121_v26 }
 0x426   : > { %v935_v39 = vpop.permute.xlu2 %934 }
 0x42b   : > { %v903_v38 = vpop.permute.xlu0 %902 }
 0x439   : > { %v871_v37 = vpop.permute.xlu1 %870 }
 0x43a   : > { %874 = vst.msk [vmem:[#allocation3] sm:$0xff] %vm873_vm3, %v871_v37  ;;  %v2185_v37 = vld [vmem:[%s3090_s18 + $0x90] sm:$0xf0] }
 0x43b   : > { %906 = vst.msk [vmem:[#allocation3] sm:$0xff] %vm905_vm4, %v903_v38  ;;  %v2191_v38 = vld [vmem:[%s3090_s18 + $0x88] sm:$0xf] }
 0x43c   : > { %938 = vst.msk [vmem:[#allocation3] sm:$0xff] %vm937_vm5, %v935_v39  ;;  %v2437_v39 = vld [vmem:[%s3090_s18 + $0x94] sm:$0xf0] }
 0x443   : > { %v939_v40 = vld [vmem:[#allocation3] sm:$0xff] }
 0x444   : > { %v940_v41 = vpack.c.bf16 %v939_v40, %v939_v40  ;;  %v2188_v40 = vor.u32 %v2434_v35, %v2185_v37 }
 0x446   : > { %1014 = vmatmul.bf16.vlgmr.msrb.gmra.mxu2 %v940_v41  ;;  %v2192_v41 = vor.u32 %v2437_v39, %v2191_v38  ;;  %1264 = vmatpush.bf16.msra.mxu0 %v2188_v40 }
 0x448   : > { %1277 = vmatpush.bf16.msra.mxu1 %v2192_v41 }
 0x44a   : > { %1265 = vmatpush.bf16.msra.mxu0 %v2172_v57 }
 0x44c   : > { %1278 = vmatpush.bf16.msra.mxu1 %v2176_v58 }
 0x4c9   : > { %v1015_v43 = vpop.f32.mrf.mxu2 }
 0x4ca   : > { %v1016_v44 = vadd.f32 %v1015_v43, %v957_v42  ;;  %v2435_v42 = vld [vmem:[%s3090_s18 + $0x8c] sm:$0xf]  ;;  %v2193_v43 = vld [vmem:[%s3090_s18 + $0x98] sm:$0xf0] }
 0x4cc   : > { %v3222_v45 = vadd.f32 %v1016_v44, %v3138_v48  ;;  %v2589_v48 = vpop.eup %2588  ;;  %v2196_v44 = vor.u32 %v2435_v42, %v2193_v43 }
 0x4cd   : > { %v1023_v0 = vmul.f32 128.0, %v2589_v48  ;;  %vm1027_vm6 = vweird.f32 %v2589_v48 }
 0x4ce   : > { %1020 = vadd.xlane.f32.xlu1 %v3222_v45  ;;  %1290 = vmatpush.bf16.msra.mxu2 %v2196_v44  ;;  %v1047_v44 = vperm.slane %v3150_v52, 2 }
 0x4cf   : > { %v1024_v1 = vsub.f32 1.0, %v1023_v0  ;;  %v2152_v0 = vor.u32 %v2428_v63, %v2151_v62  ;;  %v1084_v62 = vperm.slane %v3150_v52, 5 }
 0x4d1   : > { %v1017_v46 = vpop.f32.mrf.mxu2  ;;  %v1025_v2 = vmul.f32 %v2589_v48, %v1024_v1  ;;  %v2153_v1 = vld [vmem:[%s3090_s18 + $0x50] sm:$0xf0] }
 0x4d2   : > { %v2167_v46 = vld [vmem:[%s3090_s18 + $0x60] sm:$0xf]  ;;  %1291 = vmatpush.bf16.msra.mxu2 %v2180_v61 }
 0x4d3   : > { %v1026_v3 = vadd.f32 %v2589_v48, %v1025_v2  ;;  %v2168_v50 = vor.u32 %v2432_v47, %v2167_v46  ;;  %v2159_v2 = vld [vmem:[%s3090_s18 + $0x48] sm:$0xf] }
 0x4d5   : > { %v3233_v4 = vsel %vm1027_vm6, %v2589_v48, %v1026_v3  ;;  %1252 = vmatpush.bf16.msra.mxu3 %v2168_v50  ;;  %v2426_v48 = vld [vmem:[%s3090_s18 + $0x44] sm:$0xf]  ;;  %v2429_v3 = vld [vmem:[%s3090_s18 + $0x54] sm:$0xf0] }
 0x4d9   : > { %1253 = vmatpush.bf16.msra.mxu3 %v2152_v0 }
 0x4dd   : > { %1254 = vmatpush.bf16.msra.mxu3 %v2136_v14 }
 0x4e1   : > { %1255 = vmatpush.bf16.msra.mxu3 %v2120_v27  ;;  %v2481_v27 = vld [vmem:[%s3096_s7 + $0xf8] sm:$0xff] }
 0x4e5   : > { %1737 = vmatpush.bf16.msrb.mxu3 %v2457_v20 }
 0x541   : > { %v1021_v5 = vpop.xlane.xlu1 %1020 }
 0x542   : > { %v1029_v6 = vmul.f32 %v3233_v4, %v1021_v5  ;;  %v2156_v5 = vor.u32 %v2426_v48, %v2153_v1  ;;  %v2465_v48 = vld [vmem:[%s3096_s7 + $0x78] sm:$0xff] }
 0x544   : > { %v3237_v7 = vsub.f32 %v3222_v45, %v1029_v6  ;;  %v2160_v6 = vor.u32 %v2429_v3, %v2159_v2  ;;  %1266 = vmatpush.bf16.msra.mxu0 %v2156_v5 }
 0x546   : > { %v1031_v8 = vmul.f32 %v3237_v7, %v3237_v7  ;;  %1279 = vmatpush.bf16.msra.mxu1 %v2160_v6 }
 0x548   : > { %1032 = vadd.xlane.f32.xlu0 %v1031_v8  ;;  %v2427_v8 = vld [vmem:[%s3090_s18 + $0x4c] sm:$0xf]  ;;  %1267 = vmatpush.bf16.msra.mxu0 %v2140_v18 }
 0x549   : > { %v2164_v10 = vor.u32 %v2427_v8, %v2161_v9 }
 0x54a   : > { %1280 = vmatpush.bf16.msra.mxu1 %v2144_v19 }
 0x54b   : > { %1292 = vmatpush.bf16.msra.mxu2 %v2164_v10  ;;  %v2464_v10 = vld [vmem:[%s3096_s7 + $0x70] sm:$0xff] }
 0x54c   : > { %1268 = vmatpush.bf16.msra.mxu0 %v2124_v28  ;;  %v2463_v28 = vld [vmem:[%s3096_s7 + $0x68] sm:$0xff] }
 0x54e   : > { %1281 = vmatpush.bf16.msra.mxu1 %v2128_v32 }
 0x54f   : > { %1293 = vmatpush.bf16.msra.mxu2 %v2148_v23 }
 0x550   : > { %1750 = vmatpush.bf16.msrb.mxu0 %v2465_v48 }
 0x552   : > { %1763 = vmatpush.bf16.msrb.mxu1 %v2473_v54 }
 0x553   : > { %1294 = vmatpush.bf16.msra.mxu2 %v2132_v34 }
 0x554   : > { %1751 = vmatpush.bf16.msrb.mxu0 %v2464_v10  ;;  %v2469_v10 = vld [vmem:[%s3096_s7 + $0x98] sm:$0xff] }
 0x556   : > { %1764 = vmatpush.bf16.msrb.mxu1 %v2472_v11 }
 0x557   : > { %1776 = vmatpush.bf16.msrb.mxu2 %v2481_v27 }
 0x558   : > { %1752 = vmatpush.bf16.msrb.mxu0 %v2463_v28 }
 0x55a   : > { %1765 = vmatpush.bf16.msrb.mxu1 %v2471_v29 }
 0x5bb   : > { %v1033_v35 = vpop.xlane.xlu0 %1032 }
 0x5bc   : > { %v1034_v36 = vmul.f32 %v1033_v35, %v3233_v4  ;;  %v2456_v35 = vld [vmem:[%s3096_s7 + $0x30] sm:$0xff] }
 0x5bd   : > { %1738 = vmatpush.bf16.msrb.mxu3 %v2456_v35 }
 0x5be   : > { %v1035_v37 = vadd.f32 1e-05, %v1034_v36 }
 0x5c0   : > { %2590 = vrsqrt.f32 %v1035_v37  ;;  %vm1042_vm8 = vweird.f32 %v1035_v37 }
 0x5c6   : > { %v2591_v38 = vpop.eup %2590 }
 0x5c7   : > { %v1037_v39 = vmul.f32 %v2591_v38, %v1035_v37  ;;  %vm1043_vm7 = vweird.f32 %v2591_v38 }
 0x5c8   : > { %vm1044_vm9 = vmor %vm1042_vm8, %vm1043_vm7 }
 0x5c9   : > { %v1038_v40 = vmul.f32 %v2591_v38, %v1037_v39  ;;  %v2480_v39 = vld [vmem:[%s3096_s7 + $0xf0] sm:$0xff] }
 0x5ca   : > { %1777 = vmatpush.bf16.msrb.mxu2 %v2480_v39 }
 0x5cb   : > { %v1039_v41 = vmul.f32 0.5, %v1038_v40 }
 0x5cd   : > { %v1040_v42 = vsub.f32 1.5, %v1039_v41 }
 0x5cf   : > { %v1041_v43 = vmul.f32 %v2591_v38, %v1040_v42 }
 0x5d1   : > { %v1045_v46 = vsel %vm1044_vm9, %v2591_v38, %v1041_v43 }
 0x5d2   : > { %v1046_v47 = vmul.f32 %v1045_v46, %v3237_v7  ;;  %v445_v7 = vld [vmem:[%s3098_s29 + $0x18] sm:$0xff] }
 0x5d3   : > { %v1087_v51 = vperm.slane %v445_v7, 5 }
 0x5d4   : > { %v1048_v4 = vmul.f32 %v1047_v44, %v1046_v47 }
 0x5d6   : > { %v1050_v50 = vadd.f32 %v1049_v49, %v1048_v4  ;;  %v2462_v49 = vld [vmem:[%s3096_s7 + $0x60] sm:$0xff] }
 0x5d7   : > { %v2470_v4 = vld [vmem:[%s3096_s7 + $0xa0] sm:$0xff]  ;;  %1753 = vmatpush.bf16.msrb.mxu0 %v2462_v49 }
 0x5d8   : > { %v1051_v53 = vpack.c.bf16 %v1050_v50, %v1050_v50  ;;  %1766 = vmatpush.bf16.msrb.mxu1 %v2470_v4  ;;  %v2458_v4 = vld [vmem:[%s3096_s7 + $0x40] sm:$0xff] }
 0x5da   : > { %1256 = vmatmul.bf16.vlgmr.msra.gmra.mxu3 %v1051_v53  ;;  %1269 = vmatmul.bf16.vlgmr.msra.gmra.mxu0 %v1051_v53 }
 0x5db   : > { %1282 = vmatmul.bf16.vlgmr.msra.gmra.mxu1 %v1051_v53  ;;  %1295 = vmatmul.bf16.vlgmr.msra.gmra.mxu2 %v1051_v53 }
 0x5dc   : > { %1767 = vmatpush.bf16.msrb.mxu1 %v2469_v10 }
 0x657   : > { %v1270_v57 = vpop.f32.mrf.mxu0 }
 0x658   : > { %v3303_v58 = vadd.f32 %v1270_v57, %v1085_v55  ;;  %v1283_v59 = vpop.f32.mrf.mxu1  ;;  %v2479_v57 = vld [vmem:[%s3096_s7 + $0xe8] sm:$0xff] }
 0x659   : > { %v3306_v60 = vadd.f32 %v1283_v59, %v1086_v56  ;;  %v2455_v56 = vld [vmem:[%s3096_s7 + $0x28] sm:$0xff]  ;;  %1778 = vmatpush.bf16.msrb.mxu2 %v2479_v57 }
 0x65a   : > { %v3309_v61 = vmul.f32 0.70710677, %v3303_v58  ;;  %1739 = vmatpush.bf16.msrb.mxu3 %v2455_v56  ;;  %v2466_v56 = vld [vmem:[%s3096_s7 + $0x80] sm:$0xff] }
 0x65b   : > { %v3313_v63 = vmul.f32 0.70710677, %v3306_v60 }
 0x65c   : > { %v1348_v0 = vmul.f32 %v3309_v61, %v3309_v61 }
 0x65d   : > { %v1388_v1 = vmul.f32 %v3313_v63, %v3313_v63  ;;  %v1257_v2 = vpop.f32.mrf.mxu3 }
 0x65e   : > { %v3321_v3 = vmin.f32 %v1348_v0, 16.0  ;;  %v3323_v52 = vadd.f32 %v1257_v2, %v1084_v62  ;;  %v1296_v5 = vpop.f32.mrf.mxu2 }
 0x65f   : > { %v3325_v6 = vmin.f32 %v1388_v1, 16.0  ;;  %v3327_v8 = vadd.f32 %v1296_v5, %v1087_v51  ;;  %v1272_v9 = vpop.f32.mrf.mxu0 }
 0x660   : > { %v1350_v12 = vmul.f32 2.1237322e-06, %v3321_v3  ;;  %v1361_v13 = vmul.f32 3.8918573e-05, %v3321_v3  ;;  %v1285_v14 = vpop.f32.mrf.mxu1  ;;  %v3336_v17 = vmul.f32 0.70710677, %v3323_v52 }
 0x661   : > { %v1390_v15 = vmul.f32 2.1237322e-06, %v3325_v6  ;;  %v1401_v16 = vmul.f32 3.8918573e-05, %v3325_v6  ;;  %v3342_v24 = vmul.f32 0.70710677, %v3327_v8 }
 0x662   : > { %v1351_v18 = vadd.f32 0.00028619796, %v1350_v12  ;;  %v1362_v19 = vadd.f32 0.001143296, %v1361_v13  ;;  %v1308_v23 = vmul.f32 %v3336_v17, %v3336_v17  ;;  %v2461_v9 = vld [vmem:[%s3096_s7 + $0x58] sm:$0xff]  ;;  %v2454_v13 = vld [vmem:[%s3096_s7 + $0x20] sm:$0xff] }
 0x663   : > { %v1391_v21 = vadd.f32 0.00028619796, %v1390_v15  ;;  %v1402_v22 = vadd.f32 0.001143296, %v1401_v16  ;;  %v1428_v33 = vmul.f32 %v3342_v24, %v3342_v24  ;;  %1754 = vmatpush.bf16.msrb.mxu0 %v2461_v9  ;;  %v2478_v16 = vld [vmem:[%s3096_s7 + $0xe0] sm:$0xff]  ;;  %1740 = vmatpush.bf16.msrb.mxu3 %v2454_v13 }
 0x664   : > { %v1352_v25 = vmul.f32 %v1351_v18, %v3321_v3  ;;  %v1363_v26 = vmul.f32 %v1362_v19, %v3321_v3  ;;  %v3351_v32 = vmin.f32 %v1308_v23, 16.0  ;;  %1779 = vmatpush.bf16.msrb.mxu2 %v2478_v16  ;;  %v2450_v13 = vld [vmem:[%s3096_s7] sm:$0xff] }
 0x665   : > { %v1392_v30 = vmul.f32 %v1391_v21, %v3325_v6  ;;  %v1403_v31 = vmul.f32 %v1402_v22, %v3325_v6  ;;  %v1259_v34 = vpop.f32.mrf.mxu3  ;;  %v3361_v47 = vmin.f32 %v1428_v33, 16.0  ;;  %v2460_v21 = vld [vmem:[%s3096_s7 + $0x50] sm:$0xff]  ;;  %v2477_v33 = vld [vmem:[%s3096_s7 + $0xd8] sm:$0xff] }
 0x666   : > { %v1353_v36 = vadd.f32 0.0036580483, %v1352_v25  ;;  %v1364_v37 = vadd.f32 0.014752088, %v1363_v26  ;;  %v1298_v38 = vpop.f32.mrf.mxu2  ;;  %v1310_v42 = vmul.f32 2.1237322e-06, %v3351_v32 }
 0x667   : > { %v1393_v40 = vadd.f32 0.0036580483, %v1392_v30  ;;  %v1404_v41 = vadd.f32 0.014752088, %v1403_v31  ;;  %v1321_v46 = vmul.f32 3.8918573e-05, %v3351_v32  ;;  %1755 = vmatpush.bf16.msrb.mxu0 %v2460_v21 }
 0x668   : > { %v1354_v43 = vmul.f32 %v1353_v36, %v3321_v3  ;;  %v1365_v44 = vmul.f32 %v1364_v37, %v3321_v3  ;;  %v1311_v55 = vadd.f32 0.00028619796, %v1310_v42  ;;  %v1430_v2 = vmul.f32 2.1237322e-06, %v3361_v47  ;;  %v2468_v22 = vld [vmem:[%s3096_s7 + $0x90] sm:$0xff]  ;;  %v2453_v30 = vld [vmem:[%s3096_s7 + $0x18] sm:$0xff]  ;;  %1780 = vmatpush.bf16.msrb.mxu2 %v2477_v33 }
 0x669   : > { %v1394_v50 = vmul.f32 %v1393_v40, %v3325_v6  ;;  %v1405_v53 = vmul.f32 %v1404_v41, %v3325_v6  ;;  %v1322_v62 = vadd.f32 0.001143296, %v1321_v46  ;;  %v1441_v5 = vmul.f32 3.8918573e-05, %v3361_v47  ;;  %1768 = vmatpush.bf16.msrb.mxu1 %v2468_v22  ;;  %v2459_v37 = vld [vmem:[%s3096_s7 + $0x48] sm:$0xff]  ;;  %1741 = vmatpush.bf16.msrb.mxu3 %v2453_v30 }
 0x66a   : > { %v1355_v59 = vadd.f32 0.05243302, %v1354_v43  ;;  %v1366_v7 = vadd.f32 0.112945676, %v1365_v44  ;;  %v1312_v54 = vmul.f32 %v1311_v55, %v3351_v32  ;;  %v1431_v26 = vadd.f32 0.00028619796, %v1430_v2 }
 0x66b   : > { %v1395_v51 = vadd.f32 0.05243302, %v1394_v50  ;;  %v1406_v48 = vadd.f32 0.112945676, %v1405_v53  ;;  %v1323_v1 = vmul.f32 %v1322_v62, %v3351_v32  ;;  %v1442_v27 = vadd.f32 0.001143296, %v1441_v5  ;;  %1756 = vmatpush.bf16.msrb.mxu0 %v2459_v37 }
 0x66c   : > { %v1367_v0 = vmul.f32 %v1366_v7, %v3321_v3  ;;  %v1356_v11 = vmul.f32 %v1355_v59, %v3321_v3  ;;  %v1313_v20 = vadd.f32 0.0036580483, %v1312_v54  ;;  %v2467_v38 = vld [vmem:[%s3096_s7 + $0x88] sm:$0xff]  ;;  %v1432_v41 = vmul.f32 %v1431_v26, %v3361_v47  ;;  %v2452_v43 = vld [vmem:[%s3096_s7 + $0x10] sm:$0xff] }
 0x66d   : > { %v1407_v12 = vmul.f32 %v1406_v48, %v3325_v6  ;;  %v1324_v15 = vadd.f32 0.014752088, %v1323_v1  ;;  %v1396_v18 = vmul.f32 %v1395_v51, %v3325_v6  ;;  %v1443_v36 = vmul.f32 %v1442_v27, %v3361_v47  ;;  %v2476_v44 = vld [vmem:[%s3096_s7 + $0xd0] sm:$0xff]  ;;  %1769 = vmatpush.bf16.msrb.mxu1 %v2467_v38  ;;  %1742 = vmatpush.bf16.msrb.mxu3 %v2452_v43  ;;  %v2451_v7 = vld [vmem:[%s3096_s7 + $0x8] sm:$0xff] }
 0x66e   : > { %v1368_v14 = vadd.f32 0.4994258, %v1367_v0  ;;  %v1357_v28 = vadd.f32 0.18741608, %v1356_v11  ;;  %v1314_v40 = vmul.f32 %v1313_v20, %v3351_v32  ;;  %v1433_v55 = vadd.f32 0.0036580483, %v1432_v41  ;;  %1781 = vmatpush.bf16.msrb.mxu2 %v2476_v44 }
 0x66f   : > { %v1408_v19 = vadd.f32 0.4994258, %v1407_v12  ;;  %v1325_v25 = vmul.f32 %v1324_v15, %v3351_v32  ;;  %v1397_v39 = vadd.f32 0.18741608, %v1396_v18  ;;  %v1444_v49 = vadd.f32 0.014752088, %v1443_v36  ;;  %1757 = vmatpush.bf16.msrb.mxu0 %v2458_v4 }
 0x670   : > { %v1369_v23 = vmul.f32 %v1368_v14, %v3321_v3  ;;  %v1358_v42 = vmul.f32 %v1357_v28, %v3321_v3  ;;  %v1315_v53 = vadd.f32 0.05243302, %v1314_v40  ;;  %v2475_v51 = vld [vmem:[%s3096_s7 + $0xc8] sm:$0xff]  ;;  %v1434_v12 = vmul.f32 %v1433_v55, %v3361_v47 }
 0x671   : > { %v1409_v29 = vmul.f32 %v1408_v19, %v3325_v6  ;;  %v1326_v35 = vadd.f32 0.112945676, %v1325_v25  ;;  %v1398_v50 = vmul.f32 %v1397_v39, %v3325_v6  ;;  %v1445_v59 = vmul.f32 %v1444_v49, %v3361_v47  ;;  %1770 = vmatpush.bf16.msrb.mxu1 %v2466_v56  ;;  %1743 = vmatpush.bf16.msrb.mxu3 %v2451_v7  ;;  %v2474_v19 = vld [vmem:[%s3096_s7 + $0xc0] sm:$0xff] }
 0x672   : > { %v3387_v31 = vadd.f32 1.0, %v1369_v23  ;;  %v1359_v3 = vadd.f32 1.1283791, %v1358_v42  ;;  %v1316_v2 = vmul.f32 %v1315_v53, %v3351_v32  ;;  %1782 = vmatpush.bf16.msrb.mxu2 %v2475_v51  ;;  %v1435_v27 = vadd.f32 0.05243302, %v1434_v12 }
 0x673   : > { %v3390_v34 = vadd.f32 1.0, %v1409_v29  ;;  %v1327_v46 = vmul.f32 %v1326_v35, %v3351_v32  ;;  %v1399_v6 = vadd.f32 1.1283791, %v1398_v50  ;;  %v1446_v5 = vadd.f32 0.112945676, %v1445_v59 }
 0x674   : > { %2592 = vrcp.f32 %v3387_v31  ;;  %v1360_v9 = vmul.f32 %v1359_v3, %v3309_v61  ;;  %v1380_v14 = vand.u32 2147483647, %v3387_v31  ;;  %v1382_v15 = vand.u32 2147483648, %v3387_v31 }
 0x675   : > { %2594 = vrcp.f32 %v3390_v34  ;;  %v1328_v57 = vadd.f32 0.4994258, %v1327_v46  ;;  %v1447_v18 = vmul.f32 %v1446_v5, %v3361_v47  ;;  %v1422_v21 = vand.u32 2147483648, %v3390_v34  ;;  %1744 = vmatpush.bf16.msrb.mxu3 %v2450_v13 }
 0x676   : > { %v1420_v22 = vand.u32 2147483647, %v3390_v34  ;;  %vm1376_vm12 = vweird.f32 %v3387_v31  ;;  %v1317_v26 = vadd.f32 0.18741608, %v1316_v2  ;;  %v1383_v28 = vor.u32 1.1754944e-38, %v1382_v15  ;;  %1783 = vmatpush.bf16.msrb.mxu2 %v2474_v19 }
 0x677   : > { %v1329_v0 = vmul.f32 %v1328_v57, %v3351_v32  ;;  %v1448_v23 = vadd.f32 0.4994258, %v1447_v18  ;;  %vm1416_vm14 = vweird.f32 %v3390_v34  ;;  %vm1381_vm15 = vcmp.eq.f32.partialorder %v1380_v14, 8.507059e+37 }
 0x678   : > { %v1400_v35 = vmul.f32 %v1399_v6, %v3313_v63  ;;  %v1423_v36 = vor.u32 1.1754944e-38, %v1422_v21  ;;  %vm1421_vm1 = vcmp.eq.f32.partialorder %v1420_v22, 8.507059e+37  ;;  %v1318_v42 = vmul.f32 %v1317_v26, %v3351_v32 }
 0x679   : > { %v3414_v11 = vadd.f32 1.0, %v1329_v0  ;;  %v1449_v30 = vmul.f32 %v1448_v23, %v3361_v47  ;;  %v1301_v63 = vmul.f32 0.5, %v3303_v58  ;;  %v1302_v49 = vmul.f32 0.5, %v3306_v60 }
 0x67a   : > { %v2593_v62 = vpop.eup %2592  ;;  %v1319_v55 = vadd.f32 1.1283791, %v1318_v42  ;;  %v1303_v26 = vmul.f32 0.5, %v3327_v8 }
 0x67b   : > { %v2595_v48 = vpop.eup %2594  ;;  %v1372_v54 = vmul.f32 %v2593_v62, %v3387_v31  ;;  %vm1377_vm10 = vweird.f32 %v2593_v62  ;;  %2596 = vrcp.f32 %v3414_v11  ;;  %v1450_v31 = vadd.f32 1.0, %v1449_v30 }
 0x67c   : > { %v1412_v1 = vmul.f32 %v2595_v48, %v3390_v34  ;;  %vm1417_vm11 = vweird.f32 %v2595_v48  ;;  %vm1378_vm13 = vmor %vm1376_vm12, %vm1377_vm10  ;;  %v1436_v34 = vmul.f32 %v1435_v27, %v3361_v47  ;;  %v1342_v56 = vand.u32 2147483648, %v3414_v11 }
 0x67d   : > { %v1373_v10 = vsub.f32 1.0, %v1372_v54  ;;  %vm1418_vm0 = vmor %vm1416_vm14, %vm1417_vm11  ;;  %2598 = vrcp.f32 %v1450_v31  ;;  %v1340_v59 = vand.u32 2147483647, %v3414_v11  ;;  %vm1336_vm3 = vweird.f32 %v3414_v11 }
 0x67e   : > { %v1413_v16 = vsub.f32 1.0, %v1412_v1  ;;  %v1437_v3 = vadd.f32 0.18741608, %v1436_v34  ;;  %v1343_v60 = vor.u32 1.1754944e-38, %v1342_v56  ;;  %v1320_v1 = vmul.f32 %v1319_v55, %v3336_v17 }
 0x67f   : > { %v1374_v20 = vmul.f32 %v2593_v62, %v1373_v10  ;;  %vm1341_vm5 = vcmp.eq.f32.partialorder %v1340_v59, 8.507059e+37  ;;  %v1462_v12 = vand.u32 2147483648, %v1450_v31  ;;  %vm1456_vm7 = vweird.f32 %v1450_v31 }
 0x680   : > { %v1414_v61 = vmul.f32 %v2595_v48, %v1413_v16  ;;  %v1438_v54 = vmul.f32 %v1437_v3, %v3361_v47  ;;  %v1300_v47 = vmul.f32 0.5, %v3323_v52 }
 0x681   : > { %v1375_v25 = vadd.f32 %v2593_v62, %v1374_v20  ;;  %v2597_v39 = vpop.eup %2596  ;;  %v1463_v17 = vor.u32 1.1754944e-38, %v1462_v12 }
 0x682   : > { %v1415_v29 = vadd.f32 %v2595_v48, %v1414_v61  ;;  %v1332_v44 = vmul.f32 %v2597_v39, %v3414_v11  ;;  %vm1337_vm2 = vweird.f32 %v2597_v39  ;;  %v1439_v13 = vadd.f32 1.1283791, %v1438_v54 }
 0x683   : > { %v1379_v33 = vsel %vm1378_vm13, %v2593_v62, %v1375_v25  ;;  %v2599_v62 = vpop.eup %2598  ;;  %vm1338_vm4 = vmor %vm1336_vm3, %vm1337_vm2  ;;  %v1460_v11 = vand.u32 2147483647, %v1450_v31 }
 0x684   : > { %v1384_v37 = vsel %vm1381_vm15, %v1383_v28, %v1379_v33  ;;  %v1419_v38 = vsel %vm1418_vm0, %v2595_v48, %v1415_v29  ;;  %v1333_v50 = vsub.f32 1.0, %v1332_v44  ;;  %v1452_v0 = vmul.f32 %v2599_v62, %v1450_v31 }
 0x685   : > { %v1385_v40 = vmul.f32 %v1384_v37, %v1360_v9  ;;  %v1424_v41 = vsel %vm1421_vm1, %v1423_v36, %v1419_v38  ;;  %vm1457_vm6 = vweird.f32 %v2599_v62  ;;  %v1440_v19 = vmul.f32 %v1439_v13, %v3342_v24  ;;  %v2600_v24 = vld [vmem:[%s3098_s29] sm:$0xff] }
 0x686   : > { %v1425_v43 = vmul.f32 %v1424_v41, %v1400_v35  ;;  %v1334_v32 = vmul.f32 %v2597_v39, %v1333_v50  ;;  %v1453_v9 = vsub.f32 1.0, %v1452_v0  ;;  %vm1458_vm8 = vmor %vm1456_vm7, %vm1457_vm6  ;;  %vm1461_vm9 = vcmp.eq.f32.partialorder %v1460_v11, 8.507059e+37 }
 0x687   : > { %v2246_v46 = vclamps-f32 %v1385_v40, 1.0  ;;  %v1544_v36 = vperm.slane %v2600_v24, 4 }
 0x688   : > { %v2247_v4 = vclamps-f32 %v1425_v43, 1.0  ;;  %v1335_v48 = vadd.f32 %v2597_v39, %v1334_v32  ;;  %v1454_v14 = vmul.f32 %v2599_v62, %v1453_v9 }
 0x689   : > { %v1469_v53 = vadd.f32 1.0, %v2246_v46 }
 0x68a   : > { %v1470_v57 = vadd.f32 1.0, %v2247_v4  ;;  %v1339_v2 = vsel %vm1338_vm4, %v2597_v39, %v1335_v48  ;;  %v1455_v16 = vadd.f32 %v2599_v62, %v1454_v14 }
 0x68b   : > { %v1473_v7 = vmul.f32 %v1469_v53, %v1301_v63  ;;  %v1344_v5 = vsel %vm1341_vm5, %v1343_v60, %v1339_v2 }
 0x68c   : > { %v1474_v51 = vmul.f32 %v1470_v57, %v1302_v49  ;;  %v1345_v10 = vmul.f32 %v1344_v5, %v1320_v1  ;;  %v1459_v20 = vsel %vm1458_vm8, %v2599_v62, %v1455_v16 }
 0x68d   : > { %v1477_v58 = vpack.c.bf16 %v1473_v7, %v1473_v7  ;;  %v1464_v61 = vsel %vm1461_vm9, %v1463_v17, %v1459_v20 }
 0x68e   : > { %v1478_v6 = vpack.c.bf16 %v1474_v51, %v1474_v51  ;;  %v2245_v15 = vclamps-f32 %v1345_v10, 1.0  ;;  %v1465_v22 = vmul.f32 %v1464_v61, %v1440_v19 }
 0x68f   : > { %1758 = vmatmul.bf16.vlgmr.msrb.gmra.mxu0 %v1477_v58 }
 0x690   : > { %1771 = vmatmul.bf16.vlgmr.msrb.gmra.mxu1 %v1478_v6  ;;  %v1468_v18 = vadd.f32 1.0, %v2245_v15  ;;  %v2248_v25 = vclamps-f32 %v1465_v22, 1.0 }
 0x692   : > { %v1472_v21 = vmul.f32 %v1468_v18, %v1300_v47  ;;  %v1471_v27 = vadd.f32 1.0, %v2248_v25 }
 0x694   : > { %v1476_v23 = vpack.c.bf16 %v1472_v21, %v1472_v21  ;;  %v1475_v28 = vmul.f32 %v1471_v27, %v1303_v26 }
 0x696   : > { %1745 = vmatmul.bf16.vlgmr.msrb.gmra.mxu3 %v1476_v23  ;;  %v1479_v29 = vpack.c.bf16 %v1475_v28, %v1475_v28 }
 0x698   : > { %1784 = vmatmul.bf16.vlgmr.msrb.gmra.mxu2 %v1479_v29 }
 0x70c   : > { %v1759_v52 = vpop.f32.mrf.mxu0 }
 0x70d   : > { %v1772_v30 = vpop.f32.mrf.mxu1 }
 0x714   : > { %v1761_v33 = vpop.f32.mrf.mxu0 }
 0x715   : > { %v1774_v35 = vpop.f32.mrf.mxu1 }
 0x719   : > { %v1746_v37 = vpop.f32.mrf.mxu3 }
 0x71a   : > { %v1747_v38 = vadd.f32 %v1746_v37, %v1544_v36 }
 0x71b   : > { %v1785_v40 = vpop.f32.mrf.mxu2 }
 0x71c   : > { %v1760_v31 = vadd.f32 %v1759_v52, %v1747_v38 }
 0x71e   : > { %v1773_v39 = vadd.f32 %v1772_v30, %v1760_v31 }
 0x720   : > { %v1786_v41 = vadd.f32 %v1785_v40, %v1773_v39  ;;  %1794 = sbr.rel (%p2377_p5) target bundleno = 1830 (0x726), region = 76 }
 0x721   : > { %v1748_v42 = vpop.f32.mrf.mxu3 }
 0x722   : > { %v1789_v34 = vadd.f32 %v1786_v41, %v3222_v45 }
 0x723   : > { %v1787_v8 = vpop.f32.mrf.mxu2 }
 0x724   : > { %1790 = vst [vmem:[#allocation2] sm:$0xff] %v1789_v34 }
 0x725   : > { %1795 = vst [vmem:[#allocation15] sm:$0xff] %v1789_v34 }
 0x726 PF: > { %p2526_p7 = scmp.eq.s32.totalorder %s3003_s10, 2  ;;  %s2872_s23 = smov [#allocation15]  }
 0x727   : > { %s1802_s25 = sshll.u32 %s2872_s23, 4  ;;  %s1804_s28 = sshll.u32 %s3469_s6, 4  ;;  %s1803_s25 = int_to_ptr.vmem [resolvable:$true] %s1802_s25  ;;  %s1805_s28 = int_to_ptr.hbm [resolvable:$true] %s1804_s28 }
 0x728   : > { %2500 = dma.vmem_to_hbm [thread:$0]  (%p2526_p7), %s1803_s25, 128, %s1805_s28, [#allocation6]  }
 0x729   : > { %2842 = dma.done.wait (%p2526_p7), [#allocation6], 128  }
 0x72a   : > { %2844 = vsyncadd (%p2526_p7), [#allocation6], 4294967168 }
 0x72b PF: > { %s3486_s24 = sld [smem:[#allocation22_spill]]  ;;  %s3489_s21 = smov %s2851_s22 }
 0x72c   : > { %s3487_s15 = sld [smem:[#allocation21_spill]] }
 0x72d   : > { %s3488_s23 = sld [smem:[#allocation23_spill]] }
 0x731   : > { %p24_p10 = scmp.ge.s32.totalorder %s3486_s24, 5  }
 0x732   : > { %s3490_s22 = smov %s3487_s15 }
 0x733   :  { %26 = sbr.rel (!%p24_p10) target bundleno = 13 (0xd), region = 142 }
 0x738   :  { %1818 = vsyncpa [#allocation5], 1 }
 0x739   :  { %1820 = vsyncpa [#allocation5 + $0x1], 1 }
 0x73a   :  { %1821 = vsyncpa [#allocation8], 1 }
 0x73b   :  { %1823 = vsyncpa [#allocation8 + $0x1], 1 }
 0x73c   :  { %1824 = vsyncpa [#allocation11], 1 }
 0x73d   :  { %1826 = vsyncpa [#allocation11 + $0x1], 1 }
 0x73e   :  { %1827 = vsyncpa [#allocation14], 1 }
 0x73f   :  { %1829 = vsyncpa [#allocation14 + $0x1], 1 }
 0x740   :  { %1830 = vsyncpa [#allocation6], 1 }
 0x741   :  { %1832 = vsyncpa [#allocation6 + $0x1], 1 }

</bundles_post_ra>
